<compile_context>
chip_gen: v7x
topology: tpu7x:2x2x1
jax: 0.10.0
libtpu: 0.0.40
codegen_flags: <defaults>
</compile_context>

<pallas_src>
import jax
import jax.numpy as jnp
from jax.experimental import pallas as pl
from jax.experimental.pallas import tpu as pltpu


def _round_up(n: int, m: int) -> int:
    return -(-n // m) * m


def _pad128(n: int) -> int:
    """Round n up to a multiple of 128 (lane width)."""
    return _round_up(n, 128)


# ---------------------------------------------------------------------------
# Kernel: entire MLP for one batch tile.
# ---------------------------------------------------------------------------
def encoder_kernel(x_ref, w1_ref, w2_ref, w3_ref, w4_ref, wh_ref, b_ref, out_ref):
    # Static (trace-time) bias offsets derived from the (padded) weight shapes;
    # every segment of the packed bias operand starts on a 128-lane boundary.
    dims = [w1_ref.shape[1], w2_ref.shape[1], w3_ref.shape[1],
            w4_ref.shape[1], wh_ref.shape[1]]
    offs, off = [], 0
    for d in dims:
        offs.append(off)
        off += _pad128(d)

    def hidden(h_bf16, w_ref, boff, d):
        acc = jnp.dot(h_bf16, w_ref[...],                     # bf16 x bf16 MXU
                      preferred_element_type=jnp.float32)     # f32 accumulate
        acc = acc + b_ref[:, boff:boff + d]                   # f32 bias add
        # ReLU in f32 (VPU); hand the next MXU a bf16 intermediate.
        return jnp.maximum(acc, 0.0).astype(jnp.bfloat16)

    h = x_ref[...].astype(jnp.bfloat16)
    h = hidden(h, w1_ref, offs[0], dims[0])     # FC_input  + ReLU
    h = hidden(h, w2_ref, offs[1], dims[1])     # FC_input2 + ReLU
    h = hidden(h, w3_ref, offs[2], dims[2])     # FC_input3 + ReLU
    h = hidden(h, w4_ref, offs[3], dims[3])     # FC_input4 + ReLU
    # Fused FC_mean | FC_var head: one MXU push, lane-dense 128-wide store.
    out = jnp.dot(h, wh_ref[...], preferred_element_type=jnp.float32)
    out_ref[...] = out + b_ref[:, offs[4]:offs[4] + dims[4]]


# ---------------------------------------------------------------------------
# One-time parameter packing (NOT in the per-call hot path).
# ---------------------------------------------------------------------------
def pack_params(params):
    """Pad 400-wide dims to 512, fuse the two heads, cast weights to bf16 and
    pack all biases into a single 128-aligned f32 row.  Call once at init."""
    def pad_to(a, shape):
        return jnp.pad(a, [(0, t - s) for s, t in zip(a.shape, shape)])

    in_dim, h1 = params["w1"].shape
    h2 = params["w3"].shape[1]
    h3 = params["w4"].shape[1]
    lat = params["wm"].shape[1]
    h1p, h2p, h3p = _pad128(h1), _pad128(h2), _pad128(h3)
    headp = _pad128(2 * lat)

    w1 = pad_to(params["w1"], (in_dim, h1p))                 # pad cols
    w2 = pad_to(params["w2"], (h1p, h1p))                    # pad rows + cols
    w3 = pad_to(params["w3"], (h1p, h2p))                    # pad rows
    w4 = pad_to(params["w4"], (h2p, h3p))
    wh = pad_to(jnp.concatenate([params["wm"], params["wv"]], axis=1),
                (h3p, headp))                                 # fused heads

    biases = [pad_to(params["b1"].astype(jnp.float32), (h1p,)),
              pad_to(params["b2"].astype(jnp.float32), (h1p,)),
              pad_to(params["b3"].astype(jnp.float32), (h2p,)),
              pad_to(params["b4"].astype(jnp.float32), (h3p,)),
              pad_to(jnp.concatenate([params["bm"], params["bv"]]).astype(jnp.float32),
                     (headp,))]
    b_packed = jnp.concatenate(biases).reshape(1, -1)

    return {
        "w1": w1.astype(jnp.bfloat16),
        "w2": w2.astype(jnp.bfloat16),
        "w3": w3.astype(jnp.bfloat16),
        "w4": w4.astype(jnp.bfloat16),
        "wh": wh.astype(jnp.bfloat16),
        "b": b_packed,
        "latent_dim": lat,
    }


# ---------------------------------------------------------------------------
# Forward wrapper.
# ---------------------------------------------------------------------------
def encoder_forward(x, packed, tb=256):
    """x: (B, input_dim) f32. Returns (mean, log_var), each (B, latent_dim) f32."""
    B, input_dim = x.shape
    lat = packed["latent_dim"]
    out_width = packed["wh"].shape[1]

    # Batch tile: large enough to amortize per-step overhead and fill the MXU,
    # but keep >= 2 grid steps when possible so both v7x TensorCores get work
    # (harmless on single-TC v5e/v6e).
    tb_eff = max(8, min(tb, _round_up(B, 8)))
    if B > 8:
        tb_eff = min(tb_eff, max(8, _round_up(pl.cdiv(B, 2), 8)))
    num_tiles = pl.cdiv(B, tb_eff)

    def batch_map(i):
        return (i, 0)

    def const_map(i):
        return (0, 0)

    in_specs = [
        pl.BlockSpec((tb_eff, input_dim), batch_map),   # x: tiled over batch
        pl.BlockSpec(packed["w1"].shape, const_map),    # weights: DMA'd once,
        pl.BlockSpec(packed["w2"].shape, const_map),    # resident across tiles
        pl.BlockSpec(packed["w3"].shape, const_map),
        pl.BlockSpec(packed["w4"].shape, const_map),
        pl.BlockSpec(packed["wh"].shape, const_map),
        pl.BlockSpec(packed["b"].shape, const_map),     # packed biases
    ]
    out_specs = pl.BlockSpec((tb_eff, out_width), batch_map)

    out = pl.pallas_call(
        encoder_kernel,
        grid=(num_tiles,),
        in_specs=in_specs,
        out_specs=out_specs,
        out_shape=jax.ShapeDtypeStruct((B, out_width), jnp.float32),
        compiler_params=pltpu.CompilerParams(
            dimension_semantics=("parallel",)),
    )(x, packed["w1"], packed["w2"], packed["w3"], packed["w4"],
      packed["wh"], packed["b"])

    return out[:, :lat], out[:, lat:2 * lat]


# ---------------------------------------------------------------------------
# Parameter init + references.
# ---------------------------------------------------------------------------
def init_params(key, input_dim, hidden_dim, hidden_dim2, hidden_dim3, latent_dim):
    """PyTorch-Linear-style init (U[-1/sqrt(fan_in), 1/sqrt(fan_in)]).

    Weights stored as (in_features, out_features) so h @ W + b matches
    PyTorch's x @ W.T + b with W of shape (out_features, in_features)."""
    dims = [
        ("1", input_dim, hidden_dim),
        ("2", hidden_dim, hidden_dim),
        ("3", hidden_dim, hidden_dim2),
        ("4", hidden_dim2, hidden_dim3),
        ("m", hidden_dim3, latent_dim),
        ("v", hidden_dim3, latent_dim),
    ]
    params = {}
    for name, fan_in, fan_out in dims:
        key, kw, kb = jax.random.split(key, 3)
        bound = 1.0 / jnp.sqrt(float(fan_in))
        params[f"w{name}"] = jax.random.uniform(
            kw, (fan_in, fan_out), jnp.float32, -bound, bound)
        params[f"b{name}"] = jax.random.uniform(
            kb, (fan_out,), jnp.float32, -bound, bound)
    return params


def reference_forward_bf16(x, p):
    """Pure-JAX reference using the same bf16-MXU / f32-accumulate arithmetic."""
    def lin(h, w, b):
        return jnp.dot(h.astype(jnp.bfloat16), w.astype(jnp.bfloat16),
                       preferred_element_type=jnp.float32) + b
    h = jax.nn.relu(lin(x, p["w1"], p["b1"]))
    h = jax.nn.relu(lin(h, p["w2"], p["b2"]))
    h = jax.nn.relu(lin(h, p["w3"], p["b3"]))
    h = jax.nn.relu(lin(h, p["w4"], p["b4"]))
    return lin(h, p["wm"], p["bm"]), lin(h, p["wv"], p["bv"])


def reference_forward_f32(x, p):
    """Full-f32 reference matching the PyTorch forward exactly."""
    h = jax.nn.relu(x @ p["w1"] + p["b1"])
    h = jax.nn.relu(h @ p["w2"] + p["b2"])
    h = jax.nn.relu(h @ p["w3"] + p["b3"])
    h = jax.nn.relu(h @ p["w4"] + p["b4"])
    return h @ p["wm"] + p["bm"], h @ p["wv"] + p["bv"]


if __name__ == "__main__":
    # Hidden dims from the module's constants; a deliberately "ragged" batch
    # (not a multiple of the tile) exercises the partial-last-block path.
    batch = 100
    input_dim = 256
    hidden_dim = 400
    hidden_dim2 = 256
    hidden_dim3 = 128
    latent_dim = 64

    key = jax.random.PRNGKey(0)
    key, kx = jax.random.split(key)
    x = jax.random.normal(kx, (batch, input_dim), jnp.float32)

    params = init_params(key, input_dim, hidden_dim, hidden_dim2,
                         hidden_dim3, latent_dim)
    packed = pack_params(params)          # one-time packing, not per forward

    mean, log_var = encoder_forward(x, packed)
    jax.block_until_ready((mean, log_var))
    assert mean.shape == (batch, latent_dim)
    assert log_var.shape == (batch, latent_dim)

    # Tight check against a reference using identical bf16-MXU arithmetic
    # (zero padding contributes exactly 0 to every accumulation).
    ref_mean, ref_log_var = reference_forward_bf16(x, params)
    assert jnp.allclose(mean, ref_mean, atol=2e-3, rtol=2e-3)
    assert jnp.allclose(log_var, ref_log_var, atol=2e-3, rtol=2e-3)

    # Loose check against the exact f32 PyTorch-equivalent forward
    # (bounds the bf16-input quantization error).
    f32_mean, f32_log_var = reference_forward_f32(x, params)
    assert jnp.allclose(mean, f32_mean, atol=0.1, rtol=0.1)
    assert jnp.allclose(log_var, f32_log_var, atol=0.1, rtol=0.1)

    print("KERNEL_OK")
</pallas_src>

<mosaic_0001>
module attributes {stable_mosaic.version = 11 : i64} {
  func.func @encoder_kernel(%arg0: i32, %arg1: memref<56x256xf32, #tpu.memory_space<vmem>>, %arg2: memref<256x512xbf16, #tpu.memory_space<vmem>>, %arg3: memref<512x512xbf16, #tpu.memory_space<vmem>>, %arg4: memref<512x256xbf16, #tpu.memory_space<vmem>>, %arg5: memref<256x128xbf16, #tpu.memory_space<vmem>>, %arg6: memref<128x128xbf16, #tpu.memory_space<vmem>>, %arg7: memref<1x1536xf32, #tpu.memory_space<vmem>>, %arg8: memref<56x128xf32, #tpu.memory_space<vmem>>) attributes {dimension_semantics = [#tpu.dimension_semantics<parallel>], iteration_bounds = array<i64: 2>, scalar_prefetch = 0 : i64, scratch_operands = 0 : i64, tpu.core_type = #tpu.core_type<tc>, window_params = [{transform_indices = @transform_0, window_bounds = array<i64: 56, 256>}, {pipeline_mode = #tpu.pipeline_mode<synchronous>, transform_indices = @transform_1, window_bounds = array<i64: 256, 512>}, {pipeline_mode = #tpu.pipeline_mode<synchronous>, transform_indices = @transform_2, window_bounds = array<i64: 512, 512>}, {pipeline_mode = #tpu.pipeline_mode<synchronous>, transform_indices = @transform_3, window_bounds = array<i64: 512, 256>}, {pipeline_mode = #tpu.pipeline_mode<synchronous>, transform_indices = @transform_4, window_bounds = array<i64: 256, 128>}, {pipeline_mode = #tpu.pipeline_mode<synchronous>, transform_indices = @transform_5, window_bounds = array<i64: 128, 128>}, {pipeline_mode = #tpu.pipeline_mode<synchronous>, transform_indices = @transform_6, window_bounds = array<i64: 1, 1536>}, {transform_indices = @transform_7, window_bounds = array<i64: 56, 128>}]} {
    %c0 = arith.constant 0 : index
    %c0_0 = arith.constant 0 : index
    %0 = vector.load %arg1[%c0, %c0_0] : memref<56x256xf32, #tpu.memory_space<vmem>>, vector<56x256xf32>
    %1 = arith.truncf %0 : vector<56x256xf32> to vector<56x256xbf16>
    %c0_1 = arith.constant 0 : index
    %c0_2 = arith.constant 0 : index
    %2 = vector.load %arg2[%c0_1, %c0_2] : memref<256x512xbf16, #tpu.memory_space<vmem>>, vector<256x512xbf16>
    %cst = arith.constant dense<0.000000e+00> : vector<56x512xf32>
    %3 = tpu.matmul %1, %2, %cst {dimension_numbers = #tpu.dot_dimension_numbers<[1], [0], [0], [1], [0, 0, 1, 1], [], []>} : vector<56x256xbf16>, vector<256x512xbf16>, vector<56x512xf32> -> vector<56x512xf32>
    %c0_3 = arith.constant 0 : index
    %c0_4 = arith.constant 0 : index
    %4 = vector.load %arg7[%c0_3, %c0_4] : memref<1x1536xf32, #tpu.memory_space<vmem>>, vector<1x512xf32>
    %5 = vector.broadcast %4 : vector<1x512xf32> to vector<56x512xf32>
    %6 = arith.addf %3, %5 : vector<56x512xf32>
    %cst_5 = arith.constant 0.000000e+00 : f32
    %7 = vector.broadcast %cst_5 : f32 to vector<56x512xf32>
    %8 = arith.maximumf %6, %7 : vector<56x512xf32>
    %9 = arith.truncf %8 : vector<56x512xf32> to vector<56x512xbf16>
    %c0_6 = arith.constant 0 : index
    %c0_7 = arith.constant 0 : index
    %10 = vector.load %arg3[%c0_6, %c0_7] : memref<512x512xbf16, #tpu.memory_space<vmem>>, vector<512x512xbf16>
    %cst_8 = arith.constant dense<0.000000e+00> : vector<56x512xf32>
    %11 = tpu.matmul %9, %10, %cst_8 {dimension_numbers = #tpu.dot_dimension_numbers<[1], [0], [0], [1], [0, 0, 1, 1], [], []>} : vector<56x512xbf16>, vector<512x512xbf16>, vector<56x512xf32> -> vector<56x512xf32>
    %c0_9 = arith.constant 0 : index
    %c512 = arith.constant 512 : index
    %12 = vector.load %arg7[%c0_9, %c512] : memref<1x1536xf32, #tpu.memory_space<vmem>>, vector<1x512xf32>
    %13 = vector.broadcast %12 : vector<1x512xf32> to vector<56x512xf32>
    %14 = arith.addf %11, %13 : vector<56x512xf32>
    %cst_10 = arith.constant 0.000000e+00 : f32
    %15 = vector.broadcast %cst_10 : f32 to vector<56x512xf32>
    %16 = arith.maximumf %14, %15 : vector<56x512xf32>
    %17 = arith.truncf %16 : vector<56x512xf32> to vector<56x512xbf16>
    %c0_11 = arith.constant 0 : index
    %c0_12 = arith.constant 0 : index
    %18 = vector.load %arg4[%c0_11, %c0_12] : memref<512x256xbf16, #tpu.memory_space<vmem>>, vector<512x256xbf16>
    %cst_13 = arith.constant dense<0.000000e+00> : vector<56x256xf32>
    %19 = tpu.matmul %17, %18, %cst_13 {dimension_numbers = #tpu.dot_dimension_numbers<[1], [0], [0], [1], [0, 0, 1, 1], [], []>} : vector<56x512xbf16>, vector<512x256xbf16>, vector<56x256xf32> -> vector<56x256xf32>
    %c0_14 = arith.constant 0 : index
    %c1024 = arith.constant 1024 : index
    %20 = vector.load %arg7[%c0_14, %c1024] : memref<1x1536xf32, #tpu.memory_space<vmem>>, vector<1x256xf32>
    %21 = vector.broadcast %20 : vector<1x256xf32> to vector<56x256xf32>
    %22 = arith.addf %19, %21 : vector<56x256xf32>
    %cst_15 = arith.constant 0.000000e+00 : f32
    %23 = vector.broadcast %cst_15 : f32 to vector<56x256xf32>
    %24 = arith.maximumf %22, %23 : vector<56x256xf32>
    %25 = arith.truncf %24 : vector<56x256xf32> to vector<56x256xbf16>
    %c0_16 = arith.constant 0 : index
    %c0_17 = arith.constant 0 : index
    %26 = vector.load %arg5[%c0_16, %c0_17] : memref<256x128xbf16, #tpu.memory_space<vmem>>, vector<256x128xbf16>
    %cst_18 = arith.constant dense<0.000000e+00> : vector<56x128xf32>
    %27 = tpu.matmul %25, %26, %cst_18 {dimension_numbers = #tpu.dot_dimension_numbers<[1], [0], [0], [1], [0, 0, 1, 1], [], []>} : vector<56x256xbf16>, vector<256x128xbf16>, vector<56x128xf32> -> vector<56x128xf32>
    %c0_19 = arith.constant 0 : index
    %c1280 = arith.constant 1280 : index
    %28 = vector.load %arg7[%c0_19, %c1280] : memref<1x1536xf32, #tpu.memory_space<vmem>>, vector<1x128xf32>
    %29 = vector.broadcast %28 : vector<1x128xf32> to vector<56x128xf32>
    %30 = arith.addf %27, %29 : vector<56x128xf32>
    %cst_20 = arith.constant 0.000000e+00 : f32
    %31 = vector.broadcast %cst_20 : f32 to vector<56x128xf32>
    %32 = arith.maximumf %30, %31 : vector<56x128xf32>
    %33 = arith.truncf %32 : vector<56x128xf32> to vector<56x128xbf16>
    %c0_21 = arith.constant 0 : index
    %c0_22 = arith.constant 0 : index
    %34 = vector.load %arg6[%c0_21, %c0_22] : memref<128x128xbf16, #tpu.memory_space<vmem>>, vector<128x128xbf16>
    %cst_23 = arith.constant dense<0.000000e+00> : vector<56x128xf32>
    %35 = tpu.matmul %33, %34, %cst_23 {dimension_numbers = #tpu.dot_dimension_numbers<[1], [0], [0], [1], [0, 0, 1, 1], [], []>} : vector<56x128xbf16>, vector<128x128xbf16>, vector<56x128xf32> -> vector<56x128xf32>
    %c0_24 = arith.constant 0 : index
    %c1408 = arith.constant 1408 : index
    %36 = vector.load %arg7[%c0_24, %c1408] : memref<1x1536xf32, #tpu.memory_space<vmem>>, vector<1x128xf32>
    %37 = vector.broadcast %36 : vector<1x128xf32> to vector<56x128xf32>
    %38 = arith.addf %35, %37 : vector<56x128xf32>
    %c0_25 = arith.constant 0 : index
    %c0_26 = arith.constant 0 : index
    %39 = vector.load %arg8[%c0_25, %c0_26] : memref<56x128xf32, #tpu.memory_space<vmem>>, vector<56x128xf32>
    tpu.vector_store %arg8[%c0_25, %c0_26], %38 {strides = array<i32>} : memref<56x128xf32, #tpu.memory_space<vmem>>, vector<56x128xf32>,
    return
  }
  func.func @transform_0(%arg0: i32) -> (i32, i32) {
    %c0_i32 = arith.constant 0 : i32
    %c0_i32_0 = arith.constant 0 : i32
    return %arg0, %c0_i32 : i32, i32
  }
  func.func @transform_1(%arg0: i32) -> (i32, i32) {
    %c0_i32 = arith.constant 0 : i32
    %c0_i32_0 = arith.constant 0 : i32
    %c0_i32_1 = arith.constant 0 : i32
    return %c0_i32, %c0_i32_0 : i32, i32
  }
  func.func @transform_2(%arg0: i32) -> (i32, i32) {
    %c0_i32 = arith.constant 0 : i32
    %c0_i32_0 = arith.constant 0 : i32
    %c0_i32_1 = arith.constant 0 : i32
    return %c0_i32, %c0_i32_0 : i32, i32
  }
  func.func @transform_3(%arg0: i32) -> (i32, i32) {
    %c0_i32 = arith.constant 0 : i32
    %c0_i32_0 = arith.constant 0 : i32
    %c0_i32_1 = arith.constant 0 : i32
    return %c0_i32, %c0_i32_0 : i32, i32
  }
  func.func @transform_4(%arg0: i32) -> (i32, i32) {
    %c0_i32 = arith.constant 0 : i32
    %c0_i32_0 = arith.constant 0 : i32
    %c0_i32_1 = arith.constant 0 : i32
    return %c0_i32, %c0_i32_0 : i32, i32
  }
  func.func @transform_5(%arg0: i32) -> (i32, i32) {
    %c0_i32 = arith.constant 0 : i32
    %c0_i32_0 = arith.constant 0 : i32
    %c0_i32_1 = arith.constant 0 : i32
    return %c0_i32, %c0_i32_0 : i32, i32
  }
  func.func @transform_6(%arg0: i32) -> (i32, i32) {
    %c0_i32 = arith.constant 0 : i32
    %c0_i32_0 = arith.constant 0 : i32
    %c0_i32_1 = arith.constant 0 : i32
    return %c0_i32, %c0_i32_0 : i32, i32
  }
  func.func @transform_7(%arg0: i32) -> (i32, i32) {
    %c0_i32 = arith.constant 0 : i32
    %c0_i32_0 = arith.constant 0 : i32
    return %arg0, %c0_i32 : i32, i32
  }
}

</mosaic_0001>

<bundles_post_ra>
// kernel: tpu_custom_call.1
= control target key start
LH: loop header
LB: loop body
LE: loop exit
PB: predicated region body
PF: predicated region fallthrough
CT: control target
= control target key end

     0   :  { %s4985_s0 = inlined_call_operand.hbm [shape: f32[100,256], index: 0, kind: input, shape index: {}]   ;;  %s4986_s1 = inlined_call_operand.hbm [shape: bf16[256,512], index: 1, kind: input, shape index: {}]   ;;  %s4987_s2 = inlined_call_operand.hbm [shape: bf16[512,512], index: 2, kind: input, shape index: {}]   ;;  %s4988_s3 = inlined_call_operand.hbm [shape: bf16[512,256], index: 3, kind: input, shape index: {}]   ;;  %s4989_s4 = inlined_call_operand.hbm [shape: bf16[256,128], index: 4, kind: input, shape index: {}]   ;;  %s4990_s5 = inlined_call_operand.hbm [shape: bf16[128,128], index: 5, kind: input, shape index: {}]   ;;  %s4991_s6 = inlined_call_operand.vmem [shape: f32[1,1536], index: 6, kind: input, shape index: {}]   ;;  %s4992_s7 = inlined_call_operand.hbm [shape: f32[100,128], index: 7, kind: output, shape index: {}]  }
   0x1   :  { %5004 = sst [smem:[#allocation24_spill]] %s4986_s1 }
   0x2   :  { %5005 = sst [smem:[#allocation25_spill]] %s4992_s7 }
   0x3   :  { %12 = vsyncpa [#allocation3], 0 }
   0x4   :  { %14 = vsyncpa [#allocation3 + $0x1], 0 }
   0x5   :  { %15 = vsyncpa [#allocation6], 0 }
   0x6   :  { %16 = vsyncpa [#allocation9], 0 }
   0x7   :  { %17 = vsyncpa [#allocation12], 0 }
   0x8   :  { %18 = vsyncpa [#allocation4], 0 }
   0x9   :  { %20 = vsyncpa [#allocation4 + $0x1], 0  ;;  %s4472_s24 = smov 0   ;;  %s4474_s25 = smov 0  }
   0xa   :  { %s4476_s26 = smov 0   ;;  %s4478_s27 = smov 0  }
   0xb LB: > { %5006 = sst [smem:[#allocation19_spill]] %s4401_s24  ;;  %s4493_s28 = sadd.s32 4294967295, %s4413_s27   ;;  %s4413_s27 = sphi %s4478_s27, %s5036_s27   ;;  %s4409_s26 = sphi %s4476_s26, %s5040_s26   ;;  %s4405_s25 = sphi %s4474_s25, %s5039_s25   ;;  %s4401_s24 = sphi %s4472_s24, %s5038_s24  }
   0xc   : > { %s3175_s29 = sadd.s32 4294967294, %s4413_s27   ;;  %s4497_s30 = sadd.s32 1, %s4413_s27  }
   0xd   : > { %5007 = sst [smem:[#allocation20_spill]] %s4497_s30  ;;  %s33_s8 = sadd.s32 1, %s4409_s26 }
   0xe   : > { %s30_s9 = ssub.s32 %s4413_s27, %s4497_s30  ;;  %p40_p0 = scmp.ne.s32.totalorder %s4409_s26, %s4405_s25 }
   0xf   : > { %p31_p1 = scmp.eq.s32.totalorder %s30_s9, 0  ;;  %p41_p2 = scmp.eq.s32.totalorder %s4413_s27, 0 }
  0x10   : > { %p46_p3 = scmp.ne.s32.totalorder %s4405_s25, %s4401_s24  ;;  %p4993_p4 = scmp.eq.s32.totalorder %s4493_s28, 0 }
  0x11   : > { %s4509_s10 = scalar_select %p31_p1, %s4409_s26, %s33_s8  }
  0x12   : > { %p4511_p5 = por %p41_p2, %p40_p0  ;;  %p4517_p6 = por %p4993_p4, %p46_p3 }
  0x13   : > { %5008 = sst [smem:[#allocation21_spill]] %s4509_s10  ;;  %p196_p7 = scmp.eq.s32.totalorder %s4493_s28, 1 }
  0x14   : > { %s5009_s11 = scalar_select %p4511_p5, 1, 0 }
  0x15   : > { %s5010_s12 = scalar_select %p4517_p6, 1, 0 }
  0x16   : > { %p202_p8 = scmp.eq.s32.totalorder %s3175_s29, 1  ;;  %p3176_p9 = scmp.ge.s32.totalorder %s4413_s27, 1 }
  0x17   : > { %p209_p10 = scmp.lt.s32.totalorder %s4413_s27, 3  ;;  %p4524_p11 = por %p196_p7, %p40_p0 }
  0x18   : > { %p4528_p12 = por %p202_p8, %p46_p3  ;;  %s4415_s16 = smov [#allocation5]  }
  0x19   : > { %s5011_s13 = scalar_select %p4524_p11, 1, 0 }
  0x1a   : > { %s5013_s14 = scalar_select %p4528_p12, 1, 0 }
  0x1b   : > { %5012 = sst [smem:[#allocation22_spill]] %s5011_s13  ;;  %p4532_p13 = pnand %p3176_p9, %p209_p10 }
  0x1c   : > { %5014 = sst [smem:[#allocation23_spill]] %s5013_s14  ;;  %s221_s17 = sshll.u32 %s4415_s16, 4  ;;  %s222_s17 = int_to_ptr.vmem [resolvable:$true] %s221_s17 }
  0x1d   : > { %s5015_s15 = scalar_select %p4532_p13, 1, 0 }
  0x1e   : > { %p3681_p1 = pneg %p4532_p13  ;;  %s4416_s19 = smov [#allocation8]  }
  0x1f   : > { %s247_s20 = sshll.u32 %s4416_s19, 4  ;;  %s5017_s1 = sld [smem:[#allocation24_spill]]  ;;  %s4544_s20 = int_to_ptr.vmem [resolvable:$true] %s247_s20 }
  0x20   : > { %p4540_p2 = pnand %p3681_p1, %p4993_p4 }
  0x22   : > { %p4554_p3 = pneg %p4540_p2 }
  0x25   : > { %s4167_s23 = scalar_lea.hbm %s5017_s1, 8192 }
  0x26   : > { %p4168_p0 = scmp.ne.s32.totalorder %s5017_s1, %s4167_s23  ;;  %p4174_p9 = scmp.lt.u32.totalorder %s4167_s23, %s5017_s1 }
  0x28   : > { %p4170_p7 = pnand %p4554_p3, %p4168_p0 }
  0x2a   : > { %p4171_p8 = pneg %p4170_p7 }
  0x2c   : > { %p4176_p10 = pnand %p4174_p9, %p4171_p8 }
  0x2e   : > { %4179 = shalt.err (!%p4176_p10)
}
  0x2f   : > { %s4180_s21 = scalar_lea.vmem %s222_s17, 8192  ;;  %p4188_p11 = scmp.lt.s32.totalorder %s222_s17, %s222_s17 }
  0x30   : > { %p4181_p1 = scmp.ne.s32.totalorder %s222_s17, %s4180_s21  ;;  %p4189_p6 = scmp.lt.s32.totalorder %s4180_s21, %s4180_s21 }
  0x32   : > { %p4183_p4 = pnand %p4181_p1, %p4554_p3  ;;  %p4190_p13 = por %p4189_p6, %p4188_p11 }
  0x34   : > { %p4184_p12 = pneg %p4183_p4 }
  0x36   : > { %p4191_p5 = pnand %p4190_p13, %p4184_p12 }
  0x38   : > { %4194 = shalt.err (!%p4191_p5)
}
  0x39   : > { %s5000_s22 = smov 256   ;;  %s5001_s29 = smov 16  }
  0x3a   : > { %3684 = dma.hbm_to_vmem [thread:$0]  (!%p4540_p2), %s5017_s1, 8192, %s222_s17, [#allocation6], %s5000_s22, %s5000_s22, %s5001_s29  }
  0x3b   : > { %s4195_s10 = scalar_lea.hbm %s4988_s3, 8192 }
  0x3c   : > { %p4196_p4 = scmp.ne.s32.totalorder %s4988_s3, %s4195_s10  ;;  %p4202_p11 = scmp.lt.u32.totalorder %s4195_s10, %s4988_s3 }
  0x3e   : > { %p4198_p5 = pnand %p4196_p4, %p4554_p3 }
  0x40   : > { %p4199_p6 = pneg %p4198_p5 }
  0x42   : > { %p4204_p12 = pnand %p4202_p11, %p4199_p6 }
  0x44   : > { %4207 = shalt.err (!%p4204_p12)
}
  0x45   : > { %s4208_s17 = scalar_lea.vmem %s4544_s20, 8192  ;;  %p4216_p8 = scmp.lt.s32.totalorder %s4544_s20, %s4544_s20 }
  0x46   : > { %p4209_p13 = scmp.ne.s32.totalorder %s4544_s20, %s4208_s17  ;;  %p4217_p9 = scmp.lt.s32.totalorder %s4208_s17, %s4208_s17 }
  0x48   : > { %p4211_p0 = pnand %p4209_p13, %p4554_p3  ;;  %p4218_p10 = por %p4217_p9, %p4216_p8 }
  0x4a   : > { %p4212_p7 = pneg %p4211_p0 }
  0x4c   : > { %p4219_p1 = pnand %p4218_p10, %p4212_p7 }
  0x4e   : > { %4222 = shalt.err (!%p4219_p1)
}
  0x4f   : > { %s4419_s30 = smov 128   ;;  %s4420_s24 = smov 8  }
  0x50   : > { %3690 = dma.hbm_to_vmem [thread:$0]  (!%p4540_p2), %s4988_s3, 8192, %s4544_s20, [#allocation9], %s4419_s30, %s4419_s30, %s4420_s24  }
  0x51   : > { %s4421_s23 = smov [#allocation7]   ;;  %s4422_s16 = smov [#allocation10]  }
  0x52   : > { %s234_s8 = sshll.u32 %s4421_s23, 4  ;;  %s260_s19 = sshll.u32 %s4422_s16, 4  ;;  %s235_s8 = int_to_ptr.vmem [resolvable:$true] %s234_s8  ;;  %s261_s19 = int_to_ptr.vmem [resolvable:$true] %s260_s19 }
  0x53   : > { %s4223_s22 = scalar_lea.hbm %s4987_s2, 16384 }
  0x54   : > { %p4224_p4 = scmp.ne.s32.totalorder %s4987_s2, %s4223_s22  ;;  %p4230_p11 = scmp.lt.u32.totalorder %s4223_s22, %s4987_s2 }
  0x56   : > { %p4226_p5 = pnand %p4224_p4, %p4554_p3 }
  0x58   : > { %p4227_p6 = pneg %p4226_p5 }
  0x5a   : > { %p4232_p12 = pnand %p4230_p11, %p4227_p6 }
  0x5c   : > { %4235 = shalt.err (!%p4232_p12)
}
  0x5d   : > { %s4236_s20 = scalar_lea.vmem %s235_s8, 16384  ;;  %p4244_p8 = scmp.lt.s32.totalorder %s235_s8, %s235_s8 }
  0x5e   : > { %p4237_p13 = scmp.ne.s32.totalorder %s235_s8, %s4236_s20  ;;  %p4245_p9 = scmp.lt.s32.totalorder %s4236_s20, %s4236_s20 }
  0x60   : > { %p4239_p0 = pnand %p4237_p13, %p4554_p3  ;;  %p4246_p10 = por %p4245_p9, %p4244_p8 }
  0x62   : > { %p4240_p7 = pneg %p4239_p0 }
  0x64   : > { %p4247_p1 = pnand %p4246_p10, %p4240_p7 }
  0x66   : > { %4250 = shalt.err (!%p4247_p1)
}
  0x67   : > { %s5019_s1 = smov 16   ;;  %s5020_s29 = smov 256  }
  0x68   : > { %3687 = dma.hbm_to_vmem [thread:$0]  (!%p4540_p2), %s4987_s2, 16384, %s235_s8, [#allocation6], %s5020_s29, %s5020_s29, %s5019_s1  }
  0x69   : > { %s4251_s24 = scalar_lea.hbm %s4989_s4, 2048 }
  0x6a   : > { %p4252_p4 = scmp.ne.s32.totalorder %s4989_s4, %s4251_s24  ;;  %p4258_p11 = scmp.lt.u32.totalorder %s4251_s24, %s4989_s4 }
  0x6c   : > { %p4254_p5 = pnand %p4252_p4, %p4554_p3 }
  0x6e   : > { %p4255_p6 = pneg %p4254_p5 }
  0x70   : > { %p4260_p12 = pnand %p4258_p11, %p4255_p6 }
  0x72   : > { %4263 = shalt.err (!%p4260_p12)
}
  0x73   : > { %s4264_s21 = scalar_lea.vmem %s261_s19, 2048  ;;  %p4272_p8 = scmp.lt.s32.totalorder %s261_s19, %s261_s19 }
  0x74   : > { %p4265_p13 = scmp.ne.s32.totalorder %s261_s19, %s4264_s21  ;;  %p4273_p9 = scmp.lt.s32.totalorder %s4264_s21, %s4264_s21 }
  0x76   : > { %p4267_p0 = pnand %p4265_p13, %p4554_p3  ;;  %p4274_p10 = por %p4273_p9, %p4272_p8 }
  0x78   : > { %p4268_p7 = pneg %p4267_p0 }
  0x7a   : > { %p4275_p1 = pnand %p4274_p10, %p4268_p7 }
  0x7c   : > { %4278 = shalt.err (!%p4275_p1)
}
  0x7d   : > { %s4423_s8 = smov 64   ;;  %s4424_s17 = smov 4  }
  0x7e   : > { %3693 = dma.hbm_to_vmem [thread:$0]  (!%p4540_p2), %s4989_s4, 2048, %s261_s19, [#allocation9], %s4423_s8, %s4423_s8, %s4424_s17  }
  0x7f   : > { %s4425_s29 = smov [#allocation11]   ;;  %s4279_s30 = scalar_lea.hbm %s4990_s5, 1024 }
  0x80   : > { %s273_s7 = sshll.u32 %s4425_s29, 4  ;;  %p4280_p4 = scmp.ne.s32.totalorder %s4990_s5, %s4279_s30  ;;  %s274_s7 = int_to_ptr.vmem [resolvable:$true] %s273_s7 }
  0x81   : > { %p4286_p11 = scmp.lt.u32.totalorder %s4279_s30, %s4990_s5 }
  0x82   : > { %p4282_p5 = pnand %p4280_p4, %p4554_p3 }
  0x84   : > { %p4283_p6 = pneg %p4282_p5 }
  0x86   : > { %p4288_p12 = pnand %p4286_p11, %p4283_p6 }
  0x88   : > { %4291 = shalt.err (!%p4288_p12)
}
  0x89   : > { %s4292_s19 = scalar_lea.vmem %s274_s7, 1024  ;;  %p4300_p8 = scmp.lt.s32.totalorder %s274_s7, %s274_s7 }
  0x8a   : > { %p4293_p13 = scmp.ne.s32.totalorder %s274_s7, %s4292_s19  ;;  %p4301_p9 = scmp.lt.s32.totalorder %s4292_s19, %s4292_s19 }
  0x8c   : > { %p4295_p0 = pnand %p4293_p13, %p4554_p3  ;;  %p4302_p10 = por %p4301_p9, %p4300_p8 }
  0x8e   : > { %p4296_p7 = pneg %p4295_p0 }
  0x90   : > { %p4303_p1 = pnand %p4302_p10, %p4296_p7 }
  0x92   : > { %4306 = shalt.err (!%p4303_p1)
}
  0x93   : > { %3696 = dma.hbm_to_vmem [thread:$0]  (!%p4540_p2), %s4990_s5, 1024, %s274_s7, [#allocation12], %s4423_s8, %s4423_s8, %s4424_s17  }
  0x94   : > { %p3182_p4 = scmp.ge.s32.totalorder %s4413_s27, 2 }
  0x95   : > { %p5021_p5 = scmp.ne.s32.totalorder (!%p3182_p4), %s5009_s11, 0 }
  0x96   : > { %286 = sbr.rel (%p3182_p4) target bundleno = 192 (0xc0), region = 40 }
  0x9d   : > { %289 = sbr.rel (!%p5021_p5) target bundleno = 192 (0xc0), region = 44  ;;  %s290_s9 = sand.u32 (%p5021_p5), 1, %s4409_s26  }
  0x9e   : > { %s295_s20 = smul.u32 (%p5021_p5), 7, %s4413_s27  ;;  %s4663_s17 = scalar_lea.sflag (%p5021_p5), [#allocation3], %s290_s9 }
  0x9f   : > { %s3656_s1 = smul.u32 (%p5021_p5), 112, %s290_s9 }
  0xa0   : > { %s296_s29 = ssub.s32 (%p5021_p5), 13, %s295_s20 }
  0xa1   : > { %p297_p3 = scmp.lt.s32.totalorder (%p5021_p5), %s296_s29, 7  ;;  %s294_s7 = scalar_lea.vmem (%p5021_p5), [#allocation2], %s3656_s1 }
  0xa4   : > { %s5042_s29 = smov (!%p297_p3, %s296_s29), 7 }
  0xa5   : > { %s4660_s18 = sshll.u32 %s5042_s29, 8 }
  0xa6   : > { %s302_s8 = ssub.s32 1792, %s4660_s18 }
  0xa7   : > { %303 = vsyncadd %s4663_s17, %s302_s8  ;;  %p3185_p2 = scmp.ne.s32.totalorder %s4660_s18, 0  ;;  %s3489_s11 = smul.u32 1792, %s4413_s27 }
  0xa8   : > { %s309_s13 = sshll.u32 %s294_s7, 4  ;;  %s4311_s19 = scalar_lea.hbm %s4985_s0, 3328  ;;  %s4673_s13 = int_to_ptr.vmem [resolvable:$true] %s309_s13 }
  0xa9   : > { %s4671_s24 = scalar_lea.hbm %s4985_s0, %s3489_s11 }
  0xaa   : > { %s4307_s10 = scalar_lea.hbm %s4671_s24, %s4660_s18  ;;  %p4312_p13 = scmp.lt.u32.totalorder %s4671_s24, %s4985_s0 }
  0xab   : > { %p4308_p6 = scmp.ne.s32.totalorder %s4671_s24, %s4307_s10  ;;  %p4313_p0 = scmp.lt.u32.totalorder %s4311_s19, %s4307_s10 }
  0xac   : > { %p4315_p8 = scmp.lt.u32.totalorder %s4307_s10, %s4671_s24 }
  0xad   : > { %p4309_p11 = pnand %p4308_p6, %p3185_p2  ;;  %p4314_p7 = por %p4313_p0, %p4312_p13 }
  0xaf   : > { %p4310_p12 = pneg %p4309_p11  ;;  %p4316_p9 = por %p4315_p8, %p4314_p7 }
  0xb1   : > { %p4317_p10 = pnand %p4316_p9, %p4310_p12 }
  0xb3   : > { %4320 = shalt.err (!%p4317_p10)
}
  0xb4   : > { %s4321_s9 = scalar_lea.vmem %s4673_s13, %s4660_s18  ;;  %s4426_s20 = smov [#allocation2]  }
  0xb5   : > { %p4322_p1 = scmp.ne.s32.totalorder %s4673_s13, %s4321_s9  ;;  %s4325_s1 = sshll.u32 %s4426_s20, 4  ;;  %s4326_s1 = int_to_ptr.vmem [resolvable:$false] %s4325_s1 }
  0xb6   : > { %s4327_s29 = scalar_lea.vmem %s4326_s1, 3584  ;;  %p4328_p6 = scmp.lt.s32.totalorder %s4673_s13, %s4326_s1 }
  0xb7   : > { %p4323_p5 = pnand %p4322_p1, %p3185_p2  ;;  %p4329_p11 = scmp.lt.s32.totalorder %s4327_s29, %s4321_s9 }
  0xb9   : > { %p4324_p3 = pneg %p4323_p5  ;;  %p4330_p13 = por %p4329_p11, %p4328_p6 }
  0xbb   : > { %p4331_p0 = pnand %p4330_p13, %p4324_p3 }
  0xbd   : > { %4334 = shalt.err (!%p4331_p0)
}
  0xbe   : > { %s4427_s8 = smov 256   ;;  %s4428_s7 = smov 16  }
  0xbf   : > { %315 = dma.hbm_to_vmem [thread:$0]  (%p3185_p2), %s4671_s24, %s4660_s18, %s4673_s13, %s4663_s17, %s4427_s8, %s4427_s8, %s4428_s7  }
  0xc0 PF: > { %p5022_p12 = scmp.ne.s32.totalorder %s5015_s15, 0 }
  0xc1   : > { %s4703_s11 = sand.u32 (!%p5022_p12), 1, %s4405_s25   ;;  %p5023_p7 = scmp.ne.s32.totalorder (!%p5022_p12), %s5010_s12, 0 }
  0xc2   : > { %321 = sbr.rel (%p5022_p12) target bundleno = 1562 (0x61a), region = 48  ;;  %s324_s30 = scalar_lea.sflag (!%p5022_p12), [#allocation3], %s4703_s11 }
  0xc3   : > { %s3657_s22 = smul.u32 (!%p5022_p12), 112, %s4703_s11 }
  0xc5   : > { %s4707_s10 = scalar_lea.vmem (!%p5022_p12), [#allocation2], %s3657_s22 }
  0xc9   : > { %4380 = dma.done.wait (%p5023_p7), %s324_s30, 1792  }
  0xca   : > { %4382 = vsyncadd (%p5023_p7), %s324_s30, 4294965504  ;;  %p5024_p2 = scmp.eq.s32.totalorder %s4493_s28, 0 }
  0xcc   : > { %4384 = dma.done.wait (%p5024_p2), [#allocation6], 24576   ;;  %p5025_p8 = pmov %p5024_p2 }
  0xcd   : > { %p5026_p9 = pmov %p5024_p2 }
  0xce   : > { %4386 = vsyncadd (%p5025_p8), [#allocation6], 4294942720 }
  0xcf   : > { %4388 = dma.done.wait (%p5026_p9), [#allocation9], 10240   ;;  %p5027_p10 = pmov %p5024_p2 }
  0xd0   : > { %p5028_p1 = pmov %p5024_p2 }
  0xd1   : > { %4390 = vsyncadd (%p5027_p10), [#allocation9], 4294957056 }
  0xd2   : > { %4392 = dma.done.wait (%p5028_p1), [#allocation12], 1024   ;;  %p5029_p5 = pmov %p5028_p1 }
  0xd3   : > { %v3759_v0 = vld [vmem:[#allocation5 + $0x4] ss:$16 sps:$4 sm:$0xff]   ;;  %v3761_v1 = vld [vmem:[#allocation5] ss:$16 sps:$4 sm:$0xff]   ;;  %v391_v13 = vld [vmem:[%s4707_s10 + $0x8] sm:$0xff]  ;;  %s3658_s19 = smul.u32 56, %s4703_s11 }
  0xd4   : > { %4394 = vsyncadd (%p5029_p5), [#allocation12], 4294966272  ;;  %818 = vmatprep.subr.bf16.mxu1 %v3759_v0  ;;  %v3762_v2 = vld [vmem:[#allocation5 + $0x24] ss:$16 sps:$4 sm:$0xff]   ;;  %v3764_v3 = vld [vmem:[#allocation5 + $0x20] ss:$16 sps:$4 sm:$0xff]  }
  0xd5   : > { %819 = vmatpush1.bf16.msra.mxu1 %v3761_v1  ;;  %v3765_v4 = vld [vmem:[#allocation5 + $0x44] ss:$16 sps:$4 sm:$0xff]   ;;  %v3767_v5 = vld [vmem:[#allocation5 + $0x40] ss:$16 sps:$4 sm:$0xff]   ;;  %v393_v14 = vld [vmem:[%s4707_s10 + $0x18] sm:$0xff]  ;;  %s4913_s9 = scalar_lea.vmem [#allocation13], %s3658_s19 }
  0xd6   : > { %820 = vmatprep.subr.bf16.mxu1 %v3762_v2  ;;  %v3768_v6 = vld [vmem:[#allocation5 + $0x64] ss:$16 sps:$4 sm:$0xff]   ;;  %v3770_v7 = vld [vmem:[#allocation5 + $0x60] ss:$16 sps:$4 sm:$0xff]   ;;  %v4727_v15 = vpack.c.bf16 %v393_v14, %v391_v13  ;;  %v3809_v44 = vld [vmem:[#allocation5 + $0xc] ss:$16 sps:$4 sm:$0xff]  }
  0xd7   : > { %v3771_v8 = vld [vmem:[#allocation5 + $0x84] ss:$16 sps:$4 sm:$0xff]   ;;  %v3773_v9 = vld [vmem:[#allocation5 + $0x80] ss:$16 sps:$4 sm:$0xff]   ;;  %v395_v45 = vld [vmem:[%s4707_s10 + $0x28] sm:$0xff]  ;;  %s3035_s20 = scalar_lea.sflag [#allocation4], %s4703_s11 }
  0xd8   : > { %v3774_v10 = vld [vmem:[#allocation5 + $0xa4] ss:$16 sps:$4 sm:$0xff]   ;;  %v3776_v11 = vld [vmem:[#allocation5 + $0xa0] ss:$16 sps:$4 sm:$0xff]   ;;  %850 = vmatprep.mubr.bf16.mxu1 %v4727_v15  ;;  %v397_v47 = vld [vmem:[%s4707_s10 + $0x38] sm:$0xff]  ;;  %s5030_s1 = sld [smem:[#allocation22_spill]] }
  0xd9   : > { %821 = vmatpush1.bf16.msra.mxu1 %v3764_v3  ;;  %v3777_v12 = vld [vmem:[#allocation5 + $0xc4] ss:$16 sps:$4 sm:$0xff]   ;;  %v3779_v16 = vld [vmem:[#allocation5 + $0xc0] ss:$16 sps:$4 sm:$0xff]   ;;  %v3807_v50 = vld [vmem:[#allocation5 + $0x8] ss:$16 sps:$4 sm:$0xff]   ;;  %v4736_v52 = vpack.c.bf16 %v397_v47, %v395_v45 }
  0xda   : > { %822 = vmatprep.subr.bf16.mxu1 %v3765_v4  ;;  %v3780_v17 = vld [vmem:[#allocation5 + $0xe4] ss:$16 sps:$4 sm:$0xff]   ;;  %v3782_v18 = vld [vmem:[#allocation5 + $0xe0] ss:$16 sps:$4 sm:$0xff]   ;;  %v3812_v51 = vld [vmem:[#allocation5 + $0x2c] ss:$16 sps:$4 sm:$0xff]  }
  0xdb   : > { %v3783_v19 = vld [vmem:[#allocation5 + $0x104] ss:$16 sps:$4 sm:$0xff]   ;;  %v3785_v20 = vld [vmem:[#allocation5 + $0x100] ss:$16 sps:$4 sm:$0xff]   ;;  %v3810_v54 = vld [vmem:[#allocation5 + $0x28] ss:$16 sps:$4 sm:$0xff]  }
  0xdc   : > { %v3786_v21 = vld [vmem:[#allocation5 + $0x124] ss:$16 sps:$4 sm:$0xff]   ;;  %v3788_v22 = vld [vmem:[#allocation5 + $0x120] ss:$16 sps:$4 sm:$0xff]   ;;  %v3815_v57 = vld [vmem:[#allocation5 + $0x4c] ss:$16 sps:$4 sm:$0xff]  }
  0xdd   : > { %823 = vmatpush1.bf16.msra.mxu1 %v3767_v5  ;;  %v3789_v23 = vld [vmem:[#allocation5 + $0x144] ss:$16 sps:$4 sm:$0xff]   ;;  %v3791_v24 = vld [vmem:[#allocation5 + $0x140] ss:$16 sps:$4 sm:$0xff]   ;;  %v399_v59 = vld [vmem:[%s4707_s10 + $0x48] sm:$0xff] }
  0xde   : > { %824 = vmatprep.subr.bf16.mxu1 %v3768_v6  ;;  %v3792_v25 = vld [vmem:[#allocation5 + $0x164] ss:$16 sps:$4 sm:$0xff]   ;;  %v3794_v26 = vld [vmem:[#allocation5 + $0x160] ss:$16 sps:$4 sm:$0xff]   ;;  %v401_v60 = vld [vmem:[%s4707_s10 + $0x58] sm:$0xff]  ;;  %p5031_p3 = scmp.ne.s32.totalorder %s5030_s1, 0 }
  0xdf   : > { %v3795_v27 = vld [vmem:[#allocation5 + $0x184] ss:$16 sps:$4 sm:$0xff]   ;;  %v3797_v28 = vld [vmem:[#allocation5 + $0x180] ss:$16 sps:$4 sm:$0xff]   ;;  %v3813_v63 = vld [vmem:[#allocation5 + $0x48] ss:$16 sps:$4 sm:$0xff]   ;;  %v4746_v2 = vpack.c.bf16 %v401_v60, %v399_v59 }
  0xe0   : > { %v3798_v29 = vld [vmem:[#allocation5 + $0x1a4] ss:$16 sps:$4 sm:$0xff]   ;;  %v3860_v31 = vld [vmem:[#allocation7] ss:$16 sps:$4 sm:$0xff]   ;;  %v3818_v1 = vld [vmem:[#allocation5 + $0x6c] ss:$16 sps:$4 sm:$0xff]  }
  0xe1   : > { %825 = vmatpush1.bf16.msra.mxu1 %v3770_v7  ;;  %v3855_v30 = vld [vmem:[#allocation7 + $0x4] ss:$16 sps:$4 sm:$0xff]   ;;  %v3800_v33 = vld [vmem:[#allocation5 + $0x1a0] ss:$16 sps:$4 sm:$0xff]   ;;  %v3816_v4 = vld [vmem:[#allocation5 + $0x68] ss:$16 sps:$4 sm:$0xff]  }
  0xe2   : > { %826 = vmatprep.subr.bf16.mxu1 %v3771_v8  ;;  %1794 = vmatprep.subr.bf16.mxu0 %v3855_v30  ;;  %v3861_v32 = vld [vmem:[#allocation7 + $0x24] ss:$16 sps:$4 sm:$0xff]   ;;  %v3866_v35 = vld [vmem:[#allocation7 + $0x20] ss:$16 sps:$4 sm:$0xff]   ;;  %v3821_v6 = vld [vmem:[#allocation5 + $0x8c] ss:$16 sps:$4 sm:$0xff]  }
  0xe3   : > { %1795 = vmatpush1.bf16.msra.mxu0 %v3860_v31  ;;  %v3801_v34 = vld [vmem:[#allocation5 + $0x1c4] ss:$16 sps:$4 sm:$0xff]   ;;  %v3803_v37 = vld [vmem:[#allocation5 + $0x1c0] ss:$16 sps:$4 sm:$0xff]   ;;  %v3824_v14 = vld [vmem:[#allocation5 + $0xac] ss:$16 sps:$4 sm:$0xff]  }
  0xe4   : > { %1796 = vmatprep.subr.bf16.mxu0 %v3861_v32  ;;  %v3867_v36 = vld [vmem:[#allocation7 + $0x44] ss:$16 sps:$4 sm:$0xff]   ;;  %v3872_v39 = vld [vmem:[#allocation7 + $0x40] ss:$16 sps:$4 sm:$0xff]   ;;  %v3833_v30 = vld [vmem:[#allocation5 + $0x10c] ss:$16 sps:$4 sm:$0xff]  }
  0xe5   : > { %827 = vmatpush1.bf16.msra.mxu1 %v3773_v9  ;;  %v3804_v38 = vld [vmem:[#allocation5 + $0x1e4] ss:$16 sps:$4 sm:$0xff]   ;;  %v3806_v41 = vld [vmem:[#allocation5 + $0x1e0] ss:$16 sps:$4 sm:$0xff]   ;;  %v403_v9 = vld [vmem:[%s4707_s10 + $0x68] sm:$0xff]  ;;  %s3042_s29 = smul.u32 (%p5031_p3), 7, %s4493_s28 }
  0xe6   : > { %828 = vmatprep.subr.bf16.mxu1 %v3774_v10  ;;  %v3873_v40 = vld [vmem:[#allocation7 + $0x64] ss:$16 sps:$4 sm:$0xff]   ;;  %v3878_v46 = vld [vmem:[#allocation7 + $0x60] ss:$16 sps:$4 sm:$0xff]   ;;  %v3851_v45 = vld [vmem:[#allocation5 + $0x1cc] ss:$16 sps:$4 sm:$0xff]  }
  0xe7   : > { %1797 = vmatpush1.bf16.msra.mxu0 %v3866_v35  ;;  %v390_v42 = vld [vmem:[%s4707_s10] sm:$0xff]  ;;  %v392_v43 = vld [vmem:[%s4707_s10 + $0x10] sm:$0xff]  ;;  %v3854_v47 = vld [vmem:[#allocation5 + $0x1ec] ss:$16 sps:$4 sm:$0xff]   ;;  %s3043_s8 = ssub.s32 (%p5031_p3), 13, %s3042_s29 }
  0xe8   : > { %1798 = vmatprep.subr.bf16.mxu0 %v3867_v36  ;;  %v3879_v48 = vld [vmem:[#allocation7 + $0x84] ss:$16 sps:$4 sm:$0xff]   ;;  %v4734_v49 = vpack.c.bf16 %v392_v43, %v390_v42  ;;  %v3884_v53 = vld [vmem:[#allocation7 + $0x80] ss:$16 sps:$4 sm:$0xff]   ;;  %v3843_v42 = vld [vmem:[#allocation5 + $0x188] ss:$16 sps:$4 sm:$0xff]  }
  0xe9   : > { %829 = vmatpush1.bf16.msra.mxu1 %v3776_v11  ;;  %v394_v55 = vld [vmem:[%s4707_s10 + $0x20] sm:$0xff]  ;;  %v396_v58 = vld [vmem:[%s4707_s10 + $0x30] sm:$0xff]  ;;  %v3848_v43 = vld [vmem:[#allocation5 + $0x1ac] ss:$16 sps:$4 sm:$0xff]   ;;  %p3044_p6 = scmp.lt.s32.totalorder (%p5031_p3), %s3043_s8, 7 }
  0xea   : > { %830 = vmatprep.subr.bf16.mxu1 %v3777_v12  ;;  %v3885_v56 = vld [vmem:[#allocation7 + $0xa4] ss:$16 sps:$4 sm:$0xff]   ;;  %v3890_v61 = vld [vmem:[#allocation7 + $0xa0] ss:$16 sps:$4 sm:$0xff]   ;;  %v4744_v0 = vpack.c.bf16 %v396_v58, %v394_v55  ;;  %v3819_v12 = vld [vmem:[#allocation5 + $0x88] ss:$16 sps:$4 sm:$0xff]  }
  0xeb   : > { %1799 = vmatpush1.bf16.msra.mxu0 %v3872_v39  ;;  %v3891_v62 = vld [vmem:[#allocation7 + $0xc4] ss:$16 sps:$4 sm:$0xff]   ;;  %v3896_v3 = vld [vmem:[#allocation7 + $0xc0] ss:$16 sps:$4 sm:$0xff]   ;;  %v3837_v39 = vld [vmem:[#allocation5 + $0x148] ss:$16 sps:$4 sm:$0xff]  }
  0xec   : > { %1800 = vmatprep.subr.bf16.mxu0 %v3873_v40  ;;  %v3897_v5 = vld [vmem:[#allocation7 + $0xe4] ss:$16 sps:$4 sm:$0xff]   ;;  %v3902_v10 = vld [vmem:[#allocation7 + $0xe0] ss:$16 sps:$4 sm:$0xff]   ;;  %v3840_v40 = vld [vmem:[#allocation5 + $0x168] ss:$16 sps:$4 sm:$0xff]  }
  0xed   : > { %831 = vmatpush1.bf16.msra.mxu1 %v3779_v16  ;;  %v398_v7 = vld [vmem:[%s4707_s10 + $0x40] sm:$0xff]  ;;  %v400_v8 = vld [vmem:[%s4707_s10 + $0x50] sm:$0xff]  ;;  %v4755_v16 = vpack.c.bf16 %v403_v9, %v403_v9  ;;  %v3871_v55 = vld [vmem:[#allocation7 + $0x4c] ss:$16 sps:$4 sm:$0xff]  }
  0xee   : > { %832 = vmatprep.subr.bf16.mxu1 %v3780_v17  ;;  %v3903_v11 = vld [vmem:[#allocation7 + $0x104] ss:$16 sps:$4 sm:$0xff]   ;;  %v4753_v13 = vpack.c.bf16 %v400_v8, %v398_v7  ;;  %v3908_v17 = vld [vmem:[#allocation7 + $0x100] ss:$16 sps:$4 sm:$0xff]   ;;  %v3875_v58 = vld [vmem:[#allocation7 + $0x68] ss:$16 sps:$4 sm:$0xff]  }
  0xef   : > { %1801 = vmatpush1.bf16.msra.mxu0 %v3878_v46  ;;  %v3926_v31 = vld [vmem:[#allocation7 + $0x160] ss:$16 sps:$4 sm:$0xff]   ;;  %v3927_v32 = vld [vmem:[#allocation7 + $0x184] ss:$16 sps:$4 sm:$0xff]   ;;  %v3849_v46 = vld [vmem:[#allocation5 + $0x1c8] ss:$16 sps:$4 sm:$0xff]  }
  0xf0   : > { %1802 = vmatprep.subr.bf16.mxu0 %v3879_v48  ;;  %v3932_v35 = vld [vmem:[#allocation7 + $0x180] ss:$16 sps:$4 sm:$0xff]   ;;  %v3933_v36 = vld [vmem:[#allocation7 + $0x1a4] ss:$16 sps:$4 sm:$0xff]   ;;  %v3852_v48 = vld [vmem:[#allocation5 + $0x1e8] ss:$16 sps:$4 sm:$0xff]  }
  0xf1   : > { %833 = vmatpush1.bf16.msra.mxu1 %v3782_v18  ;;  %v3822_v18 = vld [vmem:[#allocation5 + $0xa8] ss:$16 sps:$4 sm:$0xff]   ;;  %v3883_v59 = vld [vmem:[#allocation7 + $0x8c] ss:$16 sps:$4 sm:$0xff]   ;;  %v3953_v7 = vld [vmem:[#allocation7 + $0x204] ss:$16 sps:$4 sm:$0xff]  }
  0xf2   : > { %834 = vmatprep.subr.bf16.mxu1 %v3783_v19  ;;  %v3909_v19 = vld [vmem:[#allocation7 + $0x124] ss:$16 sps:$4 sm:$0xff]   ;;  %v3881_v60 = vld [vmem:[#allocation7 + $0x88] ss:$16 sps:$4 sm:$0xff]   ;;  %v3913_v9 = vld [vmem:[#allocation7 + $0x12c] ss:$16 sps:$4 sm:$0xff]  }
  0xf3   : > { %1803 = vmatpush1.bf16.msra.mxu0 %v3884_v53  ;;  %v3865_v53 = vld [vmem:[#allocation7 + $0x2c] ss:$16 sps:$4 sm:$0xff]   ;;  %v3905_v8 = vld [vmem:[#allocation7 + $0x108] ss:$16 sps:$4 sm:$0xff]  }
  0xf4   : > { %1804 = vmatprep.subr.bf16.mxu0 %v3885_v56  ;;  %v3869_v56 = vld [vmem:[#allocation7 + $0x48] ss:$16 sps:$4 sm:$0xff]  }
  0xf5   : > { %835 = vmatpush1.bf16.msra.mxu1 %v3785_v20  ;;  %v3827_v20 = vld [vmem:[#allocation5 + $0xcc] ss:$16 sps:$4 sm:$0xff]  }
  0xf6   : > { %836 = vmatprep.subr.bf16.mxu1 %v3786_v21  ;;  %v402_v21 = vld [vmem:[%s4707_s10 + $0x60] sm:$0xff] }
  0xf7   : > { %1805 = vmatpush1.bf16.msra.mxu0 %v3890_v61  ;;  %v3889_v61 = vld [vmem:[#allocation7 + $0xac] ss:$16 sps:$4 sm:$0xff]  }
  0xf8   : > { %1806 = vmatprep.subr.bf16.mxu0 %v3891_v62  ;;  %v3895_v62 = vld [vmem:[#allocation7 + $0xcc] ss:$16 sps:$4 sm:$0xff]  }
  0xf9   : > { %837 = vmatpush1.bf16.msra.mxu1 %v3788_v22  ;;  %v3914_v22 = vld [vmem:[#allocation7 + $0x120] ss:$16 sps:$4 sm:$0xff]  }
  0xfa   : > { %838 = vmatprep.subr.bf16.mxu1 %v3789_v23  ;;  %v3915_v23 = vld [vmem:[#allocation7 + $0x144] ss:$16 sps:$4 sm:$0xff]  }
  0xfb   : > { %1807 = vmatpush1.bf16.msra.mxu0 %v3896_v3  ;;  %v3945_v3 = vld [vmem:[#allocation7 + $0x1e4] ss:$16 sps:$4 sm:$0xff]  }
  0xfc   : > { %1808 = vmatprep.subr.bf16.mxu0 %v3897_v5  ;;  %v3950_v5 = vld [vmem:[#allocation7 + $0x1e0] ss:$16 sps:$4 sm:$0xff]  }
  0xfd   : > { %839 = vmatpush1.bf16.msra.mxu1 %v3791_v24  ;;  %v3825_v24 = vld [vmem:[#allocation5 + $0xc8] ss:$16 sps:$4 sm:$0xff]  }
  0xfe   : > { %840 = vmatprep.subr.bf16.mxu1 %v3792_v25  ;;  %v3830_v25 = vld [vmem:[#allocation5 + $0xec] ss:$16 sps:$4 sm:$0xff]  }
  0xff   : > { %1809 = vmatpush1.bf16.msra.mxu0 %v3902_v10  ;;  %v3911_v10 = vld [vmem:[#allocation7 + $0x128] ss:$16 sps:$4 sm:$0xff]  }
 0x100   : > { %1810 = vmatprep.subr.bf16.mxu0 %v3903_v11  ;;  %v3919_v11 = vld [vmem:[#allocation7 + $0x14c] ss:$16 sps:$4 sm:$0xff]  }
 0x101   : > { %841 = vmatpush1.bf16.msra.mxu1 %v3794_v26  ;;  %v4760_v26 = vpack.c.bf16 %v402_v21, %v402_v21  ;;  %v3941_v21 = vld [vmem:[#allocation7 + $0x1c8] ss:$16 sps:$4 sm:$0xff]  }
 0x102   : > { %842 = vmatprep.subr.bf16.mxu1 %v3795_v27  ;;  %v3920_v27 = vld [vmem:[#allocation7 + $0x140] ss:$16 sps:$4 sm:$0xff]  }
 0x103   : > { %1811 = vmatpush1.bf16.msra.mxu0 %v3908_v17  ;;  %v3929_v17 = vld [vmem:[#allocation7 + $0x188] ss:$16 sps:$4 sm:$0xff]  }
 0x104   : > { %1812 = vmatprep.subr.bf16.mxu0 %v3909_v19  ;;  %v3935_v19 = vld [vmem:[#allocation7 + $0x1a8] ss:$16 sps:$4 sm:$0xff]  }
 0x105   : > { %843 = vmatpush1.bf16.msra.mxu1 %v3797_v28  ;;  %v3921_v28 = vld [vmem:[#allocation7 + $0x164] ss:$16 sps:$4 sm:$0xff]  }
 0x106   : > { %844 = vmatprep.subr.bf16.mxu1 %v3798_v29  ;;  %v3828_v29 = vld [vmem:[#allocation5 + $0xe8] ss:$16 sps:$4 sm:$0xff]  }
 0x107   : > { %1813 = vmatpush1.bf16.msra.mxu0 %v3914_v22  ;;  %v3949_v22 = vld [vmem:[#allocation7 + $0x1ec] ss:$16 sps:$4 sm:$0xff]  }
 0x108   : > { %1814 = vmatprep.subr.bf16.mxu0 %v3915_v23  ;;  %v3947_v23 = vld [vmem:[#allocation7 + $0x1e8] ss:$16 sps:$4 sm:$0xff]  }
 0x109   : > { %845 = vmatpush1.bf16.msra.mxu1 %v3800_v33  ;;  %v3831_v33 = vld [vmem:[#allocation5 + $0x108] ss:$16 sps:$4 sm:$0xff]  }
 0x10a   : > { %846 = vmatprep.subr.bf16.mxu1 %v3801_v34  ;;  %v3836_v34 = vld [vmem:[#allocation5 + $0x12c] ss:$16 sps:$4 sm:$0xff]  }
 0x10b   : > { %1815 = vmatpush1.bf16.msra.mxu0 %v3920_v27 }
 0x10c   : > { %1816 = vmatprep.subr.bf16.mxu0 %v3921_v28  ;;  %v4779_v28 = vld [vmem:[%s4991_s6] sm:$0xf] }
 0x10d   : > { %847 = vmatpush1.bf16.msra.mxu1 %v3803_v37  ;;  %v3834_v37 = vld [vmem:[#allocation5 + $0x128] ss:$16 sps:$4 sm:$0xff]  }
 0x10e   : > { %848 = vmatprep.subr.bf16.mxu1 %v3804_v38  ;;  %v3839_v38 = vld [vmem:[#allocation5 + $0x14c] ss:$16 sps:$4 sm:$0xff]  }
 0x10f   : > { %1817 = vmatpush1.bf16.msra.mxu0 %v3926_v31 }
 0x110   : > { %1818 = vmatprep.subr.bf16.mxu0 %v3927_v32 }
 0x111   : > { %849 = vmatpush1.bf16.msra.mxu1 %v3806_v41  ;;  %v3845_v41 = vld [vmem:[#allocation5 + $0x18c] ss:$16 sps:$4 sm:$0xff]  }
 0x112   : > { %889 = vmatprep.subr.bf16.mxu1 %v3809_v44  ;;  %v3846_v44 = vld [vmem:[#allocation5 + $0x1a8] ss:$16 sps:$4 sm:$0xff]  }
 0x113   : > { %1819 = vmatpush1.bf16.msra.mxu0 %v3932_v35 }
 0x114   : > { %851 = vmatmul.mubr.bf16.vlgmr.msra.gmra.mrb[0].mxu1 %v4734_v49  ;;  %1820 = vmatprep.subr.bf16.mxu0 %v3933_v36 }
 0x115   : > { %890 = vmatpush1.bf16.msra.mxu1 %v3807_v50  ;;  %860 = vmatprep.mubr.bf16.mxu1 %v4736_v52  ;;  %v3859_v50 = vld [vmem:[#allocation7 + $0xc] ss:$16 sps:$4 sm:$0xff]  }
 0x116   : > { %891 = vmatprep.subr.bf16.mxu1 %v3812_v51  ;;  %v3857_v51 = vld [vmem:[#allocation7 + $0x8] ss:$16 sps:$4 sm:$0xff]  }
 0x119   : > { %892 = vmatpush1.bf16.msra.mxu1 %v3810_v54  ;;  %v3863_v54 = vld [vmem:[#allocation7 + $0x28] ss:$16 sps:$4 sm:$0xff]  }
 0x11a   : > { %893 = vmatprep.subr.bf16.mxu1 %v3815_v57  ;;  %v3877_v57 = vld [vmem:[#allocation7 + $0x6c] ss:$16 sps:$4 sm:$0xff]  }
 0x11c   : > { %861 = vmatmul.mubr.bf16.gmra.mrb[4].mxu1 %v4744_v0 }
 0x11d   : > { %894 = vmatpush1.bf16.msra.mxu1 %v3813_v63  ;;  %870 = vmatprep.mubr.bf16.mxu1 %v4746_v2  ;;  %v3939_v63 = vld [vmem:[#allocation7 + $0x1c4] ss:$16 sps:$4 sm:$0xff]  }
 0x11e   : > { %895 = vmatprep.subr.bf16.mxu1 %v3818_v1  ;;  %v3944_v1 = vld [vmem:[#allocation7 + $0x1c0] ss:$16 sps:$4 sm:$0xff]  }
 0x121   : > { %896 = vmatpush1.bf16.msra.mxu1 %v3816_v4  ;;  %v3899_v4 = vld [vmem:[#allocation7 + $0xe8] ss:$16 sps:$4 sm:$0xff]  }
 0x122   : > { %897 = vmatprep.subr.bf16.mxu1 %v3821_v6  ;;  %v3907_v6 = vld [vmem:[#allocation7 + $0x10c] ss:$16 sps:$4 sm:$0xff]  }
 0x124   : > { %871 = vmatmul.mubr.bf16.gmra.mrb[8].mxu1 %v4753_v13 }
 0x125   : > { %898 = vmatpush1.bf16.msra.mxu1 %v3819_v12  ;;  %880 = vmatprep.mubr.bf16.mxu1 %v4755_v16  ;;  %v3917_v12 = vld [vmem:[#allocation7 + $0x148] ss:$16 sps:$4 sm:$0xff]  }
 0x126   : > { %899 = vmatprep.subr.bf16.mxu1 %v3824_v14  ;;  %v3923_v14 = vld [vmem:[#allocation7 + $0x168] ss:$16 sps:$4 sm:$0xff]  }
 0x129   : > { %900 = vmatpush1.bf16.msra.mxu1 %v3822_v18  ;;  %v3937_v18 = vld [vmem:[#allocation7 + $0x1ac] ss:$16 sps:$4 sm:$0xff]  }
 0x12a   : > { %901 = vmatprep.subr.bf16.mxu1 %v3827_v20  ;;  %v3943_v20 = vld [vmem:[#allocation7 + $0x1cc] ss:$16 sps:$4 sm:$0xff]  }
 0x12c   : > { %881 = vmatmul.mubr.bf16.gmra.mrb[12].mxu1 %v4760_v26 }
 0x12d   : > { %902 = vmatpush1.bf16.msra.mxu1 %v3825_v24  ;;  %921 = vmatprep.mubr.bf16.mxu1 %v4727_v15  ;;  %v3842_v15 = vld [vmem:[#allocation5 + $0x16c] ss:$16 sps:$4 sm:$0xff]  }
 0x12e   : > { %903 = vmatprep.subr.bf16.mxu1 %v3830_v25  ;;  %v3956_v24 = vld [vmem:[#allocation7 + $0x20c] ss:$16 sps:$4 sm:$0xff]   ;;  %v478_v25 = vlaneseq }
 0x131   : > { %904 = vmatpush1.bf16.msra.mxu1 %v3828_v29 }
 0x132   : > { %905 = vmatprep.subr.bf16.mxu1 %v3833_v30 }
 0x135   : > { %906 = vmatpush1.bf16.msra.mxu1 %v3831_v33 }
 0x136   : > { %907 = vmatprep.subr.bf16.mxu1 %v3836_v34 }
 0x139   : > { %908 = vmatpush1.bf16.msra.mxu1 %v3834_v37 }
 0x13a   : > { %909 = vmatprep.subr.bf16.mxu1 %v3839_v38 }
 0x13d   : > { %910 = vmatpush1.bf16.msra.mxu1 %v3837_v39 }
 0x13e   : > { %911 = vmatprep.subr.bf16.mxu1 %v3842_v15 }
 0x141   : > { %912 = vmatpush1.bf16.msra.mxu1 %v3840_v40 }
 0x142   : > { %913 = vmatprep.subr.bf16.mxu1 %v3845_v41 }
 0x145   : > { %914 = vmatpush1.bf16.msra.mxu1 %v3843_v42 }
 0x146   : > { %915 = vmatprep.subr.bf16.mxu1 %v3848_v43 }
 0x149   : > { %916 = vmatpush1.bf16.msra.mxu1 %v3846_v44 }
 0x14a   : > { %917 = vmatprep.subr.bf16.mxu1 %v3851_v45  ;;  %v3951_v45 = vld [vmem:[#allocation7 + $0x200] ss:$16 sps:$4 sm:$0xff]  }
 0x14d   : > { %918 = vmatpush1.bf16.msra.mxu1 %v3849_v46  ;;  %v3954_v46 = vld [vmem:[#allocation7 + $0x208] ss:$16 sps:$4 sm:$0xff]  }
 0x14e   : > { %919 = vmatprep.subr.bf16.mxu1 %v3854_v47 }
 0x151   : > { %920 = vmatpush1.bf16.msra.mxu1 %v3852_v48  ;;  %v3959_v48 = vld [vmem:[#allocation7 + $0x224] ss:$16 sps:$4 sm:$0xff]  }
 0x152   : > { %1936 = vmatprep.subr.bf16.mxu1 %v3859_v50  ;;  %v3962_v50 = vld [vmem:[#allocation7 + $0x22c] ss:$16 sps:$4 sm:$0xff]  }
 0x154   : > { %922 = vmatmul.mubr.bf16.vlgmr.msra.gmra.mrb[16].mxu1 %v4734_v49  ;;  %v3887_v49 = vld [vmem:[#allocation7 + $0xa8] ss:$16 sps:$4 sm:$0xff]  }
 0x155   : > { %931 = vmatprep.mubr.bf16.mxu1 %v4736_v52  ;;  %1937 = vmatpush1.bf16.msra.mxu1 %v3857_v51  ;;  %v3938_v52 = vld [vmem:[#allocation7 + $0x1a0] ss:$16 sps:$4 sm:$0xff]  }
 0x156   : > { %1938 = vmatprep.subr.bf16.mxu1 %v3865_v53  ;;  %1821 = vmatpush1.bf16.msra.mxu0 %v3938_v52  ;;  %v3965_v52 = vld [vmem:[#allocation7 + $0x244] ss:$16 sps:$4 sm:$0xff]  }
 0x157   : > { %1822 = vmatprep.subr.bf16.mxu0 %v3939_v63 }
 0x159   : > { %1939 = vmatpush1.bf16.msra.mxu1 %v3863_v54 }
 0x15a   : > { %1940 = vmatprep.subr.bf16.mxu1 %v3871_v55  ;;  %1823 = vmatpush1.bf16.msra.mxu0 %v3944_v1 }
 0x15b   : > { %1824 = vmatprep.subr.bf16.mxu0 %v3945_v3  ;;  %v3966_v3 = vld [vmem:[#allocation7 + $0x248] ss:$16 sps:$4 sm:$0xff]  }
 0x15c   : > { %932 = vmatmul.mubr.bf16.gmra.mrb[20].mxu1 %v4744_v0  ;;  %v3893_v0 = vld [vmem:[#allocation7 + $0xc8] ss:$16 sps:$4 sm:$0xff]  }
 0x15d   : > { %941 = vmatprep.mubr.bf16.mxu1 %v4746_v2  ;;  %1941 = vmatpush1.bf16.msra.mxu1 %v3869_v56  ;;  %v3901_v2 = vld [vmem:[#allocation7 + $0xec] ss:$16 sps:$4 sm:$0xff]  }
 0x15e   : > { %1942 = vmatprep.subr.bf16.mxu1 %v3877_v57  ;;  %1825 = vmatpush1.bf16.msra.mxu0 %v3950_v5 }
 0x15f   : > { %1865 = vmatprep.subr.bf16.mxu0 %v3953_v7  ;;  %v3974_v7 = vld [vmem:[#allocation7 + $0x26c] ss:$16 sps:$4 sm:$0xff]  }
 0x161   : > { %1943 = vmatpush1.bf16.msra.mxu1 %v3875_v58 }
 0x162   : > { %1944 = vmatprep.subr.bf16.mxu1 %v3883_v59  ;;  %v3957_v59 = vld [vmem:[#allocation7 + $0x220] ss:$16 sps:$4 sm:$0xff]  }
 0x164   : > { %942 = vmatmul.mubr.bf16.gmra.mrb[24].mxu1 %v4753_v13  ;;  %v3925_v13 = vld [vmem:[#allocation7 + $0x16c] ss:$16 sps:$4 sm:$0xff]  }
 0x165   : > { %951 = vmatprep.mubr.bf16.mxu1 %v4755_v16  ;;  %1945 = vmatpush1.bf16.msra.mxu1 %v3881_v60  ;;  %v3931_v16 = vld [vmem:[#allocation7 + $0x18c] ss:$16 sps:$4 sm:$0xff]   ;;  %v3960_v60 = vld [vmem:[#allocation7 + $0x228] ss:$16 sps:$4 sm:$0xff]  }
 0x166   : > { %1946 = vmatprep.subr.bf16.mxu1 %v3889_v61 }
 0x169   : > { %1947 = vmatpush1.bf16.msra.mxu1 %v3887_v49 }
 0x16a   : > { %1948 = vmatprep.subr.bf16.mxu1 %v3895_v62  ;;  %v3968_v62 = vld [vmem:[#allocation7 + $0x24c] ss:$16 sps:$4 sm:$0xff]  }
 0x16c   : > { %952 = vmatmul.mubr.bf16.gmra.mrb[28].mxu1 %v4760_v26  ;;  %v4771_v26 = vshrl.u32 %v478_v25, 7  ;;  %v3975_v25 = vld [vmem:[#allocation7 + $0x280] ss:$16 sps:$4 sm:$0xff]  }
 0x16d   : > { %1949 = vmatpush1.bf16.msra.mxu1 %v3893_v0 }
 0x16e   : > { %1950 = vmatprep.subr.bf16.mxu1 %v3901_v2  ;;  %v4774_v27 = vsub.s32 0, %v4771_v26  ;;  %v4782_v29 = vsub.s32 1, %v4771_v26  ;;  %v3963_v2 = vld [vmem:[#allocation7 + $0x240] ss:$16 sps:$4 sm:$0xff]  }
 0x170   : > { %v4786_v30 = vrot.slane %v4779_v28, %v4774_v27  ;;  %v4790_v31 = vrot.slane %v4779_v28, %v4782_v29 }
 0x171   : > { %1951 = vmatpush1.bf16.msra.mxu1 %v3899_v4 }
 0x172   : > { %1952 = vmatprep.subr.bf16.mxu1 %v3907_v6  ;;  %v3971_v6 = vld [vmem:[#allocation7 + $0x264] ss:$16 sps:$4 sm:$0xff]  }
 0x175   : > { %1953 = vmatpush1.bf16.msra.mxu1 %v3905_v8 }
 0x176   : > { %1954 = vmatprep.subr.bf16.mxu1 %v3913_v9 }
 0x179   : > { %1955 = vmatpush1.bf16.msra.mxu1 %v3911_v10 }
 0x17a   : > { %1956 = vmatprep.subr.bf16.mxu1 %v3919_v11 }
 0x17d   : > { %1957 = vmatpush1.bf16.msra.mxu1 %v3917_v12 }
 0x17e   : > { %1958 = vmatprep.subr.bf16.mxu1 %v3925_v13 }
 0x181   : > { %1959 = vmatpush1.bf16.msra.mxu1 %v3923_v14 }
 0x182   : > { %1960 = vmatprep.subr.bf16.mxu1 %v3931_v16  ;;  %v3969_v16 = vld [vmem:[#allocation7 + $0x260] ss:$16 sps:$4 sm:$0xff]  }
 0x185   : > { %1961 = vmatpush1.bf16.msra.mxu1 %v3929_v17  ;;  %v3972_v17 = vld [vmem:[#allocation7 + $0x268] ss:$16 sps:$4 sm:$0xff]  }
 0x186   : > { %1962 = vmatprep.subr.bf16.mxu1 %v3937_v18 }
 0x189   : > { %1963 = vmatpush1.bf16.msra.mxu1 %v3935_v19 }
 0x18a   : > { %1964 = vmatprep.subr.bf16.mxu1 %v3943_v20  ;;  %v3977_v20 = vld [vmem:[#allocation7 + $0x284] ss:$16 sps:$4 sm:$0xff]  }
 0x18d   : > { %1965 = vmatpush1.bf16.msra.mxu1 %v3941_v21  ;;  %v3980_v21 = vld [vmem:[#allocation7 + $0x28c] ss:$16 sps:$4 sm:$0xff]  }
 0x18e   : > { %1966 = vmatprep.subr.bf16.mxu1 %v3949_v22 }
 0x191   : > { %1967 = vmatpush1.bf16.msra.mxu1 %v3947_v23 }
 0x192   : > { %2007 = vmatprep.subr.bf16.mxu1 %v3956_v24 }
 0x1e7   : > { %v852_v32 = vpop.f32.mrb[0].mxu1 }
 0x1e8   : > { %v853_v33 = vadd.f32 %v852_v32, %v4786_v30  ;;  %v854_v34 = vpop.f32.mrb[1].mxu1  ;;  %v3978_v32 = vld [vmem:[#allocation7 + $0x288] ss:$16 sps:$4 sm:$0xff]  }
 0x1e9   : > { %v855_v35 = vadd.f32 %v854_v34, %v4790_v31  ;;  %v856_v36 = vpop.f32.mrb[2].mxu1 }
 0x1ea   : > { %v960_v37 = vmax.f32 %v853_v33, 0.0  ;;  %v857_v38 = vadd.f32 %v856_v36, %v4786_v30  ;;  %v858_v39 = vpop.f32.mrb[3].mxu1  ;;  %v3986_v36 = vld [vmem:[#allocation7 + $0x2ac] ss:$16 sps:$4 sm:$0xff]  }
 0x1eb   : > { %v859_v15 = vadd.f32 %v858_v39, %v4790_v31  ;;  %v961_v41 = vmax.f32 %v855_v35, 0.0  ;;  %v3983_v35 = vld [vmem:[#allocation7 + $0x2a4] ss:$16 sps:$4 sm:$0xff]  }
 0x1ec   : > { %v964_v40 = vmax.f32 %v857_v38, 0.0 }
 0x1ed   : > { %v965_v42 = vmax.f32 %v859_v15, 0.0 }
 0x1ee   : > { %v988_v43 = vpack.c.bf16 %v964_v40, %v960_v37 }
 0x1ef   : > { %v989_v44 = vpack.c.bf16 %v965_v42, %v961_v41  ;;  %v862_v47 = vpop.f32.mrb[4].mxu1  ;;  %v3981_v42 = vld [vmem:[#allocation7 + $0x2a0] ss:$16 sps:$4 sm:$0xff]  }
 0x1f0   : > { %v863_v51 = vadd.f32 %v862_v47, %v4786_v30  ;;  %v864_v53 = vpop.f32.mrb[5].mxu1 }
 0x1f1   : > { %1826 = vmatprep.mubr.bf16.mxu0 %v989_v44  ;;  %1968 = vmatprep.mubr.bf16.mxu1 %v989_v44  ;;  %v865_v54 = vadd.f32 %v864_v53, %v4790_v31  ;;  %v866_v55 = vpop.f32.mrb[6].mxu1  ;;  %v3993_v53 = vld [vmem:[#allocation7 + $0x2e0] ss:$16 sps:$4 sm:$0xff]  }
 0x1f2   : > { %1827 = vmatmul.mubr.bf16.vlgmr.msra.gmra.mrb[0].mxu0 %v988_v43  ;;  %1969 = vmatmul.mubr.bf16.vlgmr.msra.gmra.mrb[32].mxu1 %v988_v43  ;;  %v968_v56 = vmax.f32 %v863_v51, 0.0  ;;  %v867_v57 = vadd.f32 %v866_v55, %v4786_v30  ;;  %v868_v58 = vpop.f32.mrb[7].mxu1  ;;  %v3984_v43 = vld [vmem:[#allocation7 + $0x2a8] ss:$16 sps:$4 sm:$0xff]   ;;  %v3998_v51 = vld [vmem:[#allocation7 + $0x2ec] ss:$16 sps:$4 sm:$0xff]  }
 0x1f3   : > { %1866 = vmatpush1.bf16.msra.mxu0 %v3951_v45  ;;  %2008 = vmatpush1.bf16.msra.mxu1 %v3954_v46  ;;  %v969_v61 = vmax.f32 %v865_v54, 0.0  ;;  %v869_v49 = vadd.f32 %v868_v58, %v4790_v31  ;;  %v3989_v45 = vld [vmem:[#allocation7 + $0x2c4] ss:$16 sps:$4 sm:$0xff]   ;;  %v3992_v46 = vld [vmem:[#allocation7 + $0x2cc] ss:$16 sps:$4 sm:$0xff]  }
 0x1f4   : > { %1867 = vmatprep.subr.bf16.mxu0 %v3959_v48  ;;  %2009 = vmatprep.subr.bf16.mxu1 %v3962_v50  ;;  %v972_v63 = vmax.f32 %v867_v57, 0.0  ;;  %v3990_v48 = vld [vmem:[#allocation7 + $0x2c8] ss:$16 sps:$4 sm:$0xff]   ;;  %v3995_v50 = vld [vmem:[#allocation7 + $0x2e4] ss:$16 sps:$4 sm:$0xff]  }
 0x1f5   : > { %v973_v0 = vmax.f32 %v869_v49, 0.0  ;;  %v3996_v54 = vld [vmem:[#allocation7 + $0x2e8] ss:$16 sps:$4 sm:$0xff]   ;;  %v4001_v55 = vld [vmem:[#allocation7 + $0x304] ss:$16 sps:$4 sm:$0xff]  }
 0x1f6   : > { %v992_v1 = vpack.c.bf16 %v972_v63, %v968_v56  ;;  %v4004_v56 = vld [vmem:[#allocation7 + $0x30c] ss:$16 sps:$4 sm:$0xff]   ;;  %v3999_v57 = vld [vmem:[#allocation7 + $0x300] ss:$16 sps:$4 sm:$0xff]   ;;  %v4002_v58 = vld [vmem:[#allocation7 + $0x308] ss:$16 sps:$4 sm:$0xff]  }
 0x1f7   : > { %1868 = vmatpush1.bf16.msra.mxu0 %v3957_v59  ;;  %2010 = vmatpush1.bf16.msra.mxu1 %v3960_v60  ;;  %v993_v4 = vpack.c.bf16 %v973_v0, %v969_v61  ;;  %v872_v5 = vpop.f32.mrb[8].mxu1  ;;  %v4007_v59 = vld [vmem:[#allocation7 + $0x324] ss:$16 sps:$4 sm:$0xff]   ;;  %v4010_v60 = vld [vmem:[#allocation7 + $0x32c] ss:$16 sps:$4 sm:$0xff]  }
 0x1f8   : > { %1869 = vmatprep.subr.bf16.mxu0 %v3965_v52  ;;  %2011 = vmatprep.subr.bf16.mxu1 %v3968_v62  ;;  %v873_v8 = vadd.f32 %v872_v5, %v4786_v30  ;;  %v874_v9 = vpop.f32.mrb[9].mxu1  ;;  %v4005_v61 = vld [vmem:[#allocation7 + $0x320] ss:$16 sps:$4 sm:$0xff]   ;;  %v4008_v49 = vld [vmem:[#allocation7 + $0x328] ss:$16 sps:$4 sm:$0xff]  }
 0x1f9   : > { %v875_v10 = vadd.f32 %v874_v9, %v4790_v31  ;;  %v876_v11 = vpop.f32.mrb[10].mxu1  ;;  %1836 = vmatprep.mubr.bf16.mxu0 %v993_v4  ;;  %1978 = vmatprep.mubr.bf16.mxu1 %v993_v4  ;;  %v4013_v52 = vld [vmem:[#allocation7 + $0x344] ss:$16 sps:$4 sm:$0xff]   ;;  %v4016_v62 = vld [vmem:[#allocation7 + $0x34c] ss:$16 sps:$4 sm:$0xff]  }
 0x1fa   : > { %v976_v12 = vmax.f32 %v873_v8, 0.0  ;;  %v877_v13 = vadd.f32 %v876_v11, %v4786_v30  ;;  %v878_v14 = vpop.f32.mrb[11].mxu1  ;;  %1837 = vmatmul.mubr.bf16.gmra.mrb[4].mxu0 %v992_v1  ;;  %1979 = vmatmul.mubr.bf16.gmra.mrb[36].mxu1 %v992_v1  ;;  %v4011_v63 = vld [vmem:[#allocation7 + $0x340] ss:$16 sps:$4 sm:$0xff]   ;;  %v4014_v0 = vld [vmem:[#allocation7 + $0x348] ss:$16 sps:$4 sm:$0xff]  }
 0x1fb   : > { %1870 = vmatpush1.bf16.msra.mxu0 %v3963_v2  ;;  %2012 = vmatpush1.bf16.msra.mxu1 %v3966_v3  ;;  %v977_v18 = vmax.f32 %v875_v10, 0.0  ;;  %v879_v19 = vadd.f32 %v878_v14, %v4790_v31  ;;  %v4019_v1 = vld [vmem:[#allocation7 + $0x364] ss:$16 sps:$4 sm:$0xff]   ;;  %v4022_v2 = vld [vmem:[#allocation7 + $0x36c] ss:$16 sps:$4 sm:$0xff]   ;;  %v488_v11 = vsub.s32 2, %v4771_v26 }
 0x1fc   : > { %1871 = vmatprep.subr.bf16.mxu0 %v3971_v6  ;;  %2013 = vmatprep.subr.bf16.mxu1 %v3974_v7  ;;  %v980_v22 = vmax.f32 %v877_v13, 0.0  ;;  %v4017_v3 = vld [vmem:[#allocation7 + $0x360] ss:$16 sps:$4 sm:$0xff]   ;;  %v4020_v4 = vld [vmem:[#allocation7 + $0x368] ss:$16 sps:$4 sm:$0xff]  }
 0x1fd   : > { %v981_v23 = vmax.f32 %v879_v19, 0.0  ;;  %v4025_v5 = vld [vmem:[#allocation7 + $0x384] ss:$16 sps:$4 sm:$0xff]   ;;  %v4028_v6 = vld [vmem:[#allocation7 + $0x38c] ss:$16 sps:$4 sm:$0xff]  }
 0x1fe   : > { %v996_v24 = vpack.c.bf16 %v980_v22, %v976_v12  ;;  %v4023_v7 = vld [vmem:[#allocation7 + $0x380] ss:$16 sps:$4 sm:$0xff]   ;;  %v4026_v8 = vld [vmem:[#allocation7 + $0x388] ss:$16 sps:$4 sm:$0xff]   ;;  %v4031_v9 = vld [vmem:[#allocation7 + $0x3a4] ss:$16 sps:$4 sm:$0xff]  }
 0x1ff   : > { %1872 = vmatpush1.bf16.msra.mxu0 %v3969_v16  ;;  %2014 = vmatpush1.bf16.msra.mxu1 %v3972_v17  ;;  %v997_v33 = vpack.c.bf16 %v981_v23, %v977_v18  ;;  %v882_v34 = vpop.f32.mrb[12].mxu1  ;;  %v4034_v10 = vld [vmem:[#allocation7 + $0x3ac] ss:$16 sps:$4 sm:$0xff]   ;;  %v492_v12 = vsub.s32 3, %v4771_v26  ;;  %v4029_v13 = vld [vmem:[#allocation7 + $0x3a0] ss:$16 sps:$4 sm:$0xff]   ;;  %v4811_v16 = vrot.slane %v4779_v28, %v488_v11 }
 0x200   : > { %1873 = vmatprep.subr.bf16.mxu0 %v3977_v20  ;;  %2015 = vmatprep.subr.bf16.mxu1 %v3980_v21  ;;  %v883_v37 = vadd.f32 %v882_v34, %v4786_v30  ;;  %v884_v38 = vpop.f32.mrb[13].mxu1  ;;  %v4032_v14 = vld [vmem:[#allocation7 + $0x3a8] ss:$16 sps:$4 sm:$0xff]   ;;  %v4037_v17 = vld [vmem:[#allocation7 + $0x3c4] ss:$16 sps:$4 sm:$0xff]  }
 0x201   : > { %v885_v39 = vadd.f32 %v884_v38, %v4790_v31  ;;  %1846 = vmatprep.mubr.bf16.mxu0 %v997_v33  ;;  %1988 = vmatprep.mubr.bf16.mxu1 %v997_v33  ;;  %v886_v15 = vpop.f32.mrb[14].mxu1  ;;  %v3987_v31 = vld [vmem:[#allocation7 + $0x2c0] ss:$16 sps:$4 sm:$0xff]   ;;  %v4040_v18 = vld [vmem:[#allocation7 + $0x3cc] ss:$16 sps:$4 sm:$0xff]   ;;  %v4816_v19 = vrot.slane %v4779_v28, %v492_v12 }
 0x202   : > { %v984_v40 = vmax.f32 %v883_v37, 0.0  ;;  %1847 = vmatmul.mubr.bf16.gmra.mrb[8].mxu0 %v996_v24  ;;  %1989 = vmatmul.mubr.bf16.gmra.mrb[40].mxu1 %v996_v24  ;;  %v887_v41 = vpop.f32.mrb[15].mxu1  ;;  %v4035_v21 = vld [vmem:[#allocation7 + $0x3c0] ss:$16 sps:$4 sm:$0xff]   ;;  %v4038_v22 = vld [vmem:[#allocation7 + $0x3c8] ss:$16 sps:$4 sm:$0xff]  }
 0x203   : > { %1874 = vmatpush1.bf16.msra.mxu0 %v3975_v25  ;;  %2016 = vmatpush1.bf16.msra.mxu1 %v3978_v32  ;;  %v985_v44 = vmax.f32 %v885_v39, 0.0  ;;  %v4043_v25 = vld [vmem:[#allocation7 + $0x3e4] ss:$16 sps:$4 sm:$0xff]   ;;  %v4046_v32 = vld [vmem:[#allocation7 + $0x3ec] ss:$16 sps:$4 sm:$0xff]  }
 0x204   : > { %1875 = vmatprep.subr.bf16.mxu0 %v3983_v35  ;;  %2017 = vmatprep.subr.bf16.mxu1 %v3986_v36  ;;  %v1000_v47 = vpack.c.bf16 %v984_v40, %v984_v40  ;;  %v4041_v37 = vld [vmem:[#allocation7 + $0x3e0] ss:$16 sps:$4 sm:$0xff]   ;;  %v4044_v38 = vld [vmem:[#allocation7 + $0x3e8] ss:$16 sps:$4 sm:$0xff]   ;;  %v4049_v40 = vld [vmem:[#allocation8 + $0x4] ss:$8 sps:$4 sm:$0xff]  }
 0x205   : > { %v1001_v30 = vpack.c.bf16 %v985_v44, %v985_v44 }
 0x207   : > { %1876 = vmatpush1.bf16.msra.mxu0 %v3981_v42  ;;  %2018 = vmatpush1.bf16.msra.mxu1 %v3984_v43 }
 0x208   : > { %1877 = vmatprep.subr.bf16.mxu0 %v3989_v45  ;;  %2019 = vmatprep.subr.bf16.mxu1 %v3992_v46  ;;  %v4047_v46 = vld [vmem:[#allocation8] ss:$8 sps:$4 sm:$0xff]  }
 0x209   : > { %1856 = vmatprep.mubr.bf16.mxu0 %v1001_v30  ;;  %1998 = vmatprep.mubr.bf16.mxu1 %v1001_v30 }
 0x20a   : > { %1857 = vmatmul.mubr.bf16.gmra.mrb[12].mxu0 %v1000_v47  ;;  %1999 = vmatmul.mubr.bf16.gmra.mrb[44].mxu1 %v1000_v47 }
 0x20b   : > { %1878 = vmatpush1.bf16.msra.mxu0 %v3987_v31  ;;  %2020 = vmatpush1.bf16.msra.mxu1 %v3990_v48  ;;  %v4052_v31 = vld [vmem:[#allocation8 + $0x14] ss:$8 sps:$4 sm:$0xff]  }
 0x20c   : > { %1879 = vmatprep.subr.bf16.mxu0 %v3995_v50  ;;  %2021 = vmatprep.subr.bf16.mxu1 %v3998_v51 }
 0x20f   : > { %1880 = vmatpush1.bf16.msra.mxu0 %v3993_v53  ;;  %2022 = vmatpush1.bf16.msra.mxu1 %v3996_v54 }
 0x210   : > { %1881 = vmatprep.subr.bf16.mxu0 %v4001_v55  ;;  %2023 = vmatprep.subr.bf16.mxu1 %v4004_v56 }
 0x213   : > { %1882 = vmatpush1.bf16.msra.mxu0 %v3999_v57  ;;  %2024 = vmatpush1.bf16.msra.mxu1 %v4002_v58  ;;  %v4050_v57 = vld [vmem:[#allocation8 + $0x10] ss:$8 sps:$4 sm:$0xff]  }
 0x214   : > { %1883 = vmatprep.subr.bf16.mxu0 %v4007_v59  ;;  %2025 = vmatprep.subr.bf16.mxu1 %v4010_v60  ;;  %v4055_v59 = vld [vmem:[#allocation8 + $0x24] ss:$8 sps:$4 sm:$0xff]  }
 0x217   : > { %1884 = vmatpush1.bf16.msra.mxu0 %v4005_v61  ;;  %2026 = vmatpush1.bf16.msra.mxu1 %v4008_v49 }
 0x218   : > { %1885 = vmatprep.subr.bf16.mxu0 %v4013_v52  ;;  %2027 = vmatprep.subr.bf16.mxu1 %v4016_v62  ;;  %v4053_v62 = vld [vmem:[#allocation8 + $0x20] ss:$8 sps:$4 sm:$0xff]  }
 0x21b   : > { %1886 = vmatpush1.bf16.msra.mxu0 %v4011_v63  ;;  %2028 = vmatpush1.bf16.msra.mxu1 %v4014_v0 }
 0x21c   : > { %1887 = vmatprep.subr.bf16.mxu0 %v4019_v1  ;;  %2029 = vmatprep.subr.bf16.mxu1 %v4022_v2  ;;  %v4058_v1 = vld [vmem:[#allocation8 + $0x34] ss:$8 sps:$4 sm:$0xff]  }
 0x21f   : > { %1888 = vmatpush1.bf16.msra.mxu0 %v4017_v3  ;;  %2030 = vmatpush1.bf16.msra.mxu1 %v4020_v4 }
 0x220   : > { %1889 = vmatprep.subr.bf16.mxu0 %v4025_v5  ;;  %2031 = vmatprep.subr.bf16.mxu1 %v4028_v6 }
 0x223   : > { %1890 = vmatpush1.bf16.msra.mxu0 %v4023_v7  ;;  %2032 = vmatpush1.bf16.msra.mxu1 %v4026_v8 }
 0x224   : > { %1891 = vmatprep.subr.bf16.mxu0 %v4031_v9  ;;  %2033 = vmatprep.subr.bf16.mxu1 %v4034_v10  ;;  %v4056_v9 = vld [vmem:[#allocation8 + $0x30] ss:$8 sps:$4 sm:$0xff]  }
 0x227   : > { %v923_v20 = vpop.f32.mrb[16].mxu1  ;;  %1892 = vmatpush1.bf16.msra.mxu0 %v4029_v13  ;;  %2034 = vmatpush1.bf16.msra.mxu1 %v4032_v14  ;;  %v4061_v13 = vld [vmem:[#allocation8 + $0x44] ss:$8 sps:$4 sm:$0xff]  }
 0x228   : > { %v924_v23 = vadd.f32 %v923_v20, %v4811_v16  ;;  %v925_v24 = vpop.f32.mrb[17].mxu1  ;;  %1893 = vmatprep.subr.bf16.mxu0 %v4037_v17  ;;  %2035 = vmatprep.subr.bf16.mxu1 %v4040_v18 }
 0x229   : > { %v926_v33 = vadd.f32 %v925_v24, %v4816_v19  ;;  %v927_v34 = vpop.f32.mrb[18].mxu1  ;;  %v4064_v24 = vld [vmem:[#allocation8 + $0x54] ss:$8 sps:$4 sm:$0xff]  }
 0x22a   : > { %v928_v35 = vadd.f32 %v927_v34, %v4811_v16  ;;  %v929_v36 = vpop.f32.mrb[19].mxu1  ;;  %v962_v39 = vmax.f32 %v924_v23, 0.0 }
 0x22b   : > { %v930_v28 = vadd.f32 %v929_v36, %v4816_v19  ;;  %1894 = vmatpush1.bf16.msra.mxu0 %v4035_v21  ;;  %2036 = vmatpush1.bf16.msra.mxu1 %v4038_v22  ;;  %v963_v41 = vmax.f32 %v926_v33, 0.0  ;;  %v4059_v21 = vld [vmem:[#allocation8 + $0x40] ss:$8 sps:$4 sm:$0xff]   ;;  %v4062_v36 = vld [vmem:[#allocation8 + $0x50] ss:$8 sps:$4 sm:$0xff]  }
 0x22c   : > { %v966_v15 = vmax.f32 %v928_v35, 0.0  ;;  %1895 = vmatprep.subr.bf16.mxu0 %v4043_v25  ;;  %2037 = vmatprep.subr.bf16.mxu1 %v4046_v32 }
 0x22d   : > { %v967_v42 = vmax.f32 %v930_v28, 0.0 }
 0x22e   : > { %v990_v43 = vpack.c.bf16 %v966_v15, %v962_v39  ;;  %v4070_v39 = vld [vmem:[#allocation8 + $0x74] ss:$8 sps:$4 sm:$0xff]   ;;  %v4073_v15 = vld [vmem:[#allocation8 + $0x84] ss:$8 sps:$4 sm:$0xff]  }
 0x22f   : > { %v991_v44 = vpack.c.bf16 %v967_v42, %v963_v41  ;;  %v933_v45 = vpop.f32.mrb[20].mxu1  ;;  %1896 = vmatpush1.bf16.msra.mxu0 %v4041_v37  ;;  %2038 = vmatpush1.bf16.msra.mxu1 %v4044_v38  ;;  %v4067_v37 = vld [vmem:[#allocation8 + $0x64] ss:$8 sps:$4 sm:$0xff]   ;;  %v4076_v41 = vld [vmem:[#allocation8 + $0x94] ss:$8 sps:$4 sm:$0xff]  }
 0x230   : > { %v934_v30 = vadd.f32 %v933_v45, %v4811_v16  ;;  %v935_v47 = vpop.f32.mrb[21].mxu1  ;;  %2518 = vmatprep.subr.bf16.mxu0 %v4049_v40  ;;  %v4071_v40 = vld [vmem:[#allocation8 + $0x80] ss:$8 sps:$4 sm:$0xff]   ;;  %v4074_v42 = vld [vmem:[#allocation8 + $0x90] ss:$8 sps:$4 sm:$0xff]  }
 0x231   : > { %v936_v48 = vadd.f32 %v935_v47, %v4816_v19  ;;  %v937_v50 = vpop.f32.mrb[22].mxu1  ;;  %1897 = vmatprep.mubr.bf16.mxu0 %v991_v44  ;;  %2039 = vmatprep.mubr.bf16.mxu1 %v991_v44  ;;  %v4077_v44 = vld [vmem:[#allocation8 + $0xa0] ss:$8 sps:$4 sm:$0xff]   ;;  %v4082_v45 = vld [vmem:[#allocation8 + $0xb4] ss:$8 sps:$4 sm:$0xff]  }
 0x232   : > { %v970_v51 = vmax.f32 %v934_v30, 0.0  ;;  %v938_v53 = vadd.f32 %v937_v50, %v4811_v16  ;;  %v939_v54 = vpop.f32.mrb[23].mxu1  ;;  %1898 = vmatmul.mubr.bf16.vlgmr.msra.gmra.mrb[0].mxu0 %v990_v43  ;;  %2040 = vmatmul.mubr.bf16.vlgmr.msra.gmra.mrb[32].mxu1 %v990_v43  ;;  %v4079_v43 = vld [vmem:[#allocation8 + $0xa4] ss:$8 sps:$4 sm:$0xff]   ;;  %v4083_v47 = vld [vmem:[#allocation8 + $0xc0] ss:$8 sps:$4 sm:$0xff]  }
 0x233   : > { %v971_v55 = vmax.f32 %v936_v48, 0.0  ;;  %v940_v56 = vadd.f32 %v939_v54, %v4816_v19  ;;  %2519 = vmatpush1.bf16.msra.mxu0 %v4047_v46  ;;  %v4080_v46 = vld [vmem:[#allocation8 + $0xb0] ss:$8 sps:$4 sm:$0xff]   ;;  %v4085_v30 = vld [vmem:[#allocation8 + $0xc4] ss:$8 sps:$4 sm:$0xff]  }
 0x234   : > { %v974_v58 = vmax.f32 %v938_v53, 0.0  ;;  %2520 = vmatprep.subr.bf16.mxu0 %v4052_v31  ;;  %v4088_v31 = vld [vmem:[#allocation8 + $0xd4] ss:$8 sps:$4 sm:$0xff]   ;;  %v4086_v48 = vld [vmem:[#allocation8 + $0xd0] ss:$8 sps:$4 sm:$0xff]  }
 0x235   : > { %v975_v60 = vmax.f32 %v940_v56, 0.0  ;;  %v4091_v50 = vld [vmem:[#allocation8 + $0xe4] ss:$8 sps:$4 sm:$0xff]   ;;  %v4094_v53 = vld [vmem:[#allocation8 + $0xf4] ss:$8 sps:$4 sm:$0xff]  }
 0x236   : > { %v994_v61 = vpack.c.bf16 %v974_v58, %v970_v51  ;;  %v4089_v51 = vld [vmem:[#allocation8 + $0xe0] ss:$8 sps:$4 sm:$0xff]   ;;  %v4092_v54 = vld [vmem:[#allocation8 + $0xf0] ss:$8 sps:$4 sm:$0xff]   ;;  %v1132_v56 = vld [vmem:[%s4991_s6 + $0x4] sm:$0xf] }
 0x237   : > { %v995_v49 = vpack.c.bf16 %v975_v60, %v971_v55  ;;  %v943_v52 = vpop.f32.mrb[24].mxu1  ;;  %2521 = vmatpush1.bf16.msra.mxu0 %v4050_v57  ;;  %v4097_v55 = vld [vmem:[#allocation8 + $0x104] ss:$8 sps:$4 sm:$0xff]   ;;  %v4836_v57 = vrot.slane %v1132_v56, %v4774_v27  ;;  %v4840_v58 = vrot.slane %v1132_v56, %v488_v11  ;;  %v4847_v60 = vrot.slane %v1132_v56, %v492_v12 }
 0x238   : > { %v944_v63 = vadd.f32 %v943_v52, %v4811_v16  ;;  %v945_v0 = vpop.f32.mrb[25].mxu1  ;;  %2522 = vmatprep.subr.bf16.mxu0 %v4055_v59  ;;  %v4843_v59 = vrot.slane %v1132_v56, %v4782_v29 }
 0x239   : > { %v946_v2 = vadd.f32 %v945_v0, %v4816_v19  ;;  %v947_v3 = vpop.f32.mrb[26].mxu1  ;;  %1907 = vmatprep.mubr.bf16.mxu0 %v995_v49  ;;  %2049 = vmatprep.mubr.bf16.mxu1 %v995_v49 }
 0x23a   : > { %v978_v4 = vmax.f32 %v944_v63, 0.0  ;;  %v948_v5 = vadd.f32 %v947_v3, %v4811_v16  ;;  %v949_v6 = vpop.f32.mrb[27].mxu1  ;;  %1908 = vmatmul.mubr.bf16.gmra.mrb[4].mxu0 %v994_v61  ;;  %2050 = vmatmul.mubr.bf16.gmra.mrb[36].mxu1 %v994_v61 }
 0x23b   : > { %v979_v7 = vmax.f32 %v946_v2, 0.0  ;;  %v950_v8 = vadd.f32 %v949_v6, %v4816_v19  ;;  %2523 = vmatpush1.bf16.msra.mxu0 %v4053_v62 }
 0x23c   : > { %v982_v10 = vmax.f32 %v948_v5, 0.0  ;;  %2524 = vmatprep.subr.bf16.mxu0 %v4058_v1 }
 0x23d   : > { %v983_v14 = vmax.f32 %v950_v8, 0.0 }
 0x23e   : > { %v998_v17 = vpack.c.bf16 %v982_v10, %v978_v4 }
 0x23f   : > { %v999_v18 = vpack.c.bf16 %v983_v14, %v979_v7  ;;  %v953_v20 = vpop.f32.mrb[28].mxu1  ;;  %2525 = vmatpush1.bf16.msra.mxu0 %v4056_v9 }
 0x240   : > { %v954_v22 = vadd.f32 %v953_v20, %v4811_v16  ;;  %v955_v23 = vpop.f32.mrb[29].mxu1  ;;  %2526 = vmatprep.subr.bf16.mxu0 %v4061_v13  ;;  %v4065_v16 = vld [vmem:[#allocation8 + $0x60] ss:$8 sps:$4 sm:$0xff]  }
 0x241   : > { %1917 = vmatprep.mubr.bf16.mxu0 %v999_v18  ;;  %2059 = vmatprep.mubr.bf16.mxu1 %v999_v18  ;;  %v956_v25 = vadd.f32 %v955_v23, %v4816_v19  ;;  %v957_v32 = vpop.f32.mrb[30].mxu1  ;;  %v4068_v19 = vld [vmem:[#allocation8 + $0x70] ss:$8 sps:$4 sm:$0xff]  }
 0x242   : > { %v986_v33 = vmax.f32 %v954_v22, 0.0  ;;  %1918 = vmatmul.mubr.bf16.gmra.mrb[8].mxu0 %v998_v17  ;;  %2060 = vmatmul.mubr.bf16.gmra.mrb[40].mxu1 %v998_v17  ;;  %v958_v34 = vpop.f32.mrb[31].mxu1 }
 0x243   : > { %v987_v35 = vmax.f32 %v956_v25, 0.0  ;;  %2527 = vmatpush1.bf16.msra.mxu0 %v4059_v21 }
 0x244   : > { %2528 = vmatprep.subr.bf16.mxu0 %v4064_v24  ;;  %v1002_v38 = vpack.c.bf16 %v986_v33, %v986_v33  ;;  %v4095_v33 = vld [vmem:[#allocation8 + $0x100] ss:$8 sps:$4 sm:$0xff]  }
 0x245   : > { %v1003_v28 = vpack.c.bf16 %v987_v35, %v987_v35 }
 0x247   : > { %1927 = vmatprep.mubr.bf16.mxu0 %v1003_v28  ;;  %2069 = vmatprep.mubr.bf16.mxu1 %v1003_v28 }
 0x248   : > { %2529 = vmatpush1.bf16.msra.mxu0 %v4062_v36 }
 0x249   : > { %2530 = vmatprep.subr.bf16.mxu0 %v4067_v37  ;;  %v4100_v37 = vld [vmem:[#allocation8 + $0x114] ss:$8 sps:$4 sm:$0xff]  }
 0x24a   : > { %1928 = vmatmul.mubr.bf16.gmra.mrb[12].mxu0 %v1002_v38  ;;  %2070 = vmatmul.mubr.bf16.gmra.mrb[44].mxu1 %v1002_v38 }
 0x24c   : > { %2531 = vmatpush1.bf16.msra.mxu0 %v4065_v16 }
 0x24d   : > { %2532 = vmatprep.subr.bf16.mxu0 %v4070_v39 }
 0x250   : > { %2533 = vmatpush1.bf16.msra.mxu0 %v4068_v19 }
 0x251   : > { %2534 = vmatprep.subr.bf16.mxu0 %v4073_v15 }
 0x254   : > { %2535 = vmatpush1.bf16.msra.mxu0 %v4071_v40 }
 0x255   : > { %2536 = vmatprep.subr.bf16.mxu0 %v4076_v41 }
 0x258   : > { %2537 = vmatpush1.bf16.msra.mxu0 %v4074_v42 }
 0x259   : > { %2538 = vmatprep.subr.bf16.mxu0 %v4079_v43 }
 0x25c   : > { %2539 = vmatpush1.bf16.msra.mxu0 %v4077_v44 }
 0x25d   : > { %2540 = vmatprep.subr.bf16.mxu0 %v4082_v45  ;;  %v4098_v45 = vld [vmem:[#allocation8 + $0x110] ss:$8 sps:$4 sm:$0xff]  }
 0x260   : > { %2541 = vmatpush1.bf16.msra.mxu0 %v4080_v46 }
 0x261   : > { %2542 = vmatprep.subr.bf16.mxu0 %v4085_v30 }
 0x264   : > { %2543 = vmatpush1.bf16.msra.mxu0 %v4083_v47 }
 0x265   : > { %2544 = vmatprep.subr.bf16.mxu0 %v4088_v31 }
 0x268   : > { %2545 = vmatpush1.bf16.msra.mxu0 %v4086_v48  ;;  %v4103_v48 = vld [vmem:[#allocation8 + $0x124] ss:$8 sps:$4 sm:$0xff]  }
 0x269   : > { %2546 = vmatprep.subr.bf16.mxu0 %v4091_v50 }
 0x26c   : > { %2547 = vmatpush1.bf16.msra.mxu0 %v4089_v51 }
 0x26d   : > { %2548 = vmatprep.subr.bf16.mxu0 %v4094_v53 }
 0x270   : > { %2549 = vmatpush1.bf16.msra.mxu0 %v4092_v54 }
 0x271   : > { %2589 = vmatprep.subr.bf16.mxu0 %v4097_v55 }
 0x305   : > { %v1899_v61 = vpop.f32.mrb[0].mxu0  ;;  %v2041_v49 = vpop.f32.mrb[32].mxu1 }
 0x306   : > { %v3566_v52 = vadd.f32 %v1899_v61, %v4836_v57  ;;  %v3580_v62 = vadd.f32 %v2041_v49, %v4840_v58  ;;  %v1901_v63 = vpop.f32.mrb[1].mxu0  ;;  %v2043_v0 = vpop.f32.mrb[33].mxu1 }
 0x307   : > { %v3567_v1 = vadd.f32 %v1901_v63, %v4843_v59  ;;  %v3581_v11 = vadd.f32 %v2043_v0, %v4847_v60  ;;  %v1903_v2 = vpop.f32.mrb[2].mxu0  ;;  %v2045_v3 = vpop.f32.mrb[34].mxu1  ;;  %v4101_v63 = vld [vmem:[#allocation8 + $0x120] ss:$8 sps:$4 sm:$0xff]  }
 0x308   : > { %v3568_v4 = vadd.f32 %v1903_v2, %v4836_v57  ;;  %v3582_v26 = vadd.f32 %v2045_v3, %v4840_v58  ;;  %v1905_v12 = vpop.f32.mrb[3].mxu0  ;;  %v2047_v5 = vpop.f32.mrb[35].mxu1  ;;  %v2078_v8 = vmax.f32 %v3566_v52, 0.0  ;;  %v2080_v9 = vmax.f32 %v3580_v62, 0.0  ;;  %v4106_v3 = vld [vmem:[#allocation8 + $0x134] ss:$8 sps:$4 sm:$0xff]  }
 0x309   : > { %v3569_v6 = vadd.f32 %v1905_v12, %v4843_v59  ;;  %v3583_v7 = vadd.f32 %v2047_v5, %v4847_v60  ;;  %v2079_v14 = vmax.f32 %v3567_v1, 0.0  ;;  %v2081_v17 = vmax.f32 %v3581_v11, 0.0 }
 0x30a   : > { %v2082_v10 = vmax.f32 %v3568_v4, 0.0  ;;  %v2084_v13 = vmax.f32 %v3582_v26, 0.0 }
 0x30b   : > { %v2083_v18 = vmax.f32 %v3569_v6, 0.0  ;;  %v2085_v20 = vmax.f32 %v3583_v7, 0.0 }
 0x30c   : > { %v2106_v21 = vpack.c.bf16 %v2082_v10, %v2078_v8  ;;  %v4857_v22 = vpack.c.bf16 %v2084_v13, %v2080_v9 }
 0x30d   : > { %v2107_v23 = vpack.c.bf16 %v2083_v18, %v2079_v14  ;;  %v4859_v24 = vpack.c.bf16 %v2085_v20, %v2081_v17  ;;  %v1909_v25 = vpop.f32.mrb[4].mxu0  ;;  %v2051_v32 = vpop.f32.mrb[36].mxu1  ;;  %v4104_v14 = vld [vmem:[#allocation8 + $0x130] ss:$8 sps:$4 sm:$0xff]  }
 0x30e   : > { %v3570_v34 = vadd.f32 %v1909_v25, %v4836_v57  ;;  %v3584_v35 = vadd.f32 %v2051_v32, %v4840_v58  ;;  %v1911_v36 = vpop.f32.mrb[5].mxu0  ;;  %v2053_v28 = vpop.f32.mrb[37].mxu1 }
 0x30f   : > { %v3571_v38 = vadd.f32 %v1911_v36, %v4843_v59  ;;  %v3585_v16 = vadd.f32 %v2053_v28, %v4847_v60  ;;  %v1913_v39 = vpop.f32.mrb[6].mxu0  ;;  %v2055_v19 = vpop.f32.mrb[38].mxu1  ;;  %2550 = vmatprep.mubr.bf16.mxu0 %v2107_v23  ;;  %v4109_v23 = vld [vmem:[#allocation8 + $0x144] ss:$8 sps:$4 sm:$0xff]  }
 0x310   : > { %v3572_v15 = vadd.f32 %v1913_v39, %v4836_v57  ;;  %v3586_v40 = vadd.f32 %v2055_v19, %v4840_v58  ;;  %v1915_v41 = vpop.f32.mrb[7].mxu0  ;;  %v2057_v42 = vpop.f32.mrb[39].mxu1  ;;  %2551 = vmatmul.mubr.bf16.vlgmr.msra.gmra.mrb[16].mxu0 %v2106_v21  ;;  %v2086_v46 = vmax.f32 %v3570_v34, 0.0  ;;  %v2088_v30 = vmax.f32 %v3584_v35, 0.0  ;;  %v4107_v39 = vld [vmem:[#allocation8 + $0x140] ss:$8 sps:$4 sm:$0xff]  }
 0x311   : > { %v3573_v43 = vadd.f32 %v1915_v41, %v4843_v59  ;;  %v3587_v44 = vadd.f32 %v2057_v42, %v4847_v60  ;;  %2590 = vmatpush1.bf16.msra.mxu0 %v4095_v33  ;;  %v2087_v50 = vmax.f32 %v3571_v38, 0.0  ;;  %v2089_v51 = vmax.f32 %v3585_v16, 0.0  ;;  %v4112_v41 = vld [vmem:[#allocation8 + $0x154] ss:$8 sps:$4 sm:$0xff]  }
 0x312   : > { %v2090_v47 = vmax.f32 %v3572_v15, 0.0  ;;  %v2092_v31 = vmax.f32 %v3586_v40, 0.0  ;;  %2591 = vmatprep.subr.bf16.mxu0 %v4100_v37 }
 0x313   : > { %v2091_v53 = vmax.f32 %v3573_v43, 0.0  ;;  %v2093_v54 = vmax.f32 %v3587_v44, 0.0 }
 0x314   : > { %v2110_v55 = vpack.c.bf16 %v2090_v47, %v2086_v46  ;;  %v4869_v56 = vpack.c.bf16 %v2092_v31, %v2088_v30  ;;  %v4110_v47 = vld [vmem:[#allocation8 + $0x150] ss:$8 sps:$4 sm:$0xff]  }
 0x315   : > { %v2111_v61 = vpack.c.bf16 %v2091_v53, %v2087_v50  ;;  %v4871_v49 = vpack.c.bf16 %v2093_v54, %v2089_v51  ;;  %2592 = vmatpush1.bf16.msra.mxu0 %v4098_v45  ;;  %v1919_v52 = vpop.f32.mrb[8].mxu0  ;;  %v2061_v62 = vpop.f32.mrb[40].mxu1  ;;  %v4113_v50 = vld [vmem:[#allocation8 + $0x160] ss:$8 sps:$4 sm:$0xff]   ;;  %v4118_v53 = vld [vmem:[#allocation8 + $0x174] ss:$8 sps:$4 sm:$0xff]  }
 0x316   : > { %v3574_v0 = vadd.f32 %v1919_v52, %v4836_v57  ;;  %v3588_v1 = vadd.f32 %v2061_v62, %v4840_v58  ;;  %v1921_v11 = vpop.f32.mrb[9].mxu0  ;;  %v2063_v2 = vpop.f32.mrb[41].mxu1  ;;  %2593 = vmatprep.subr.bf16.mxu0 %v4103_v48  ;;  %v4115_v48 = vld [vmem:[#allocation8 + $0x164] ss:$8 sps:$4 sm:$0xff]   ;;  %v4122_v52 = vld [vmem:[#allocation8 + $0x190] ss:$8 sps:$4 sm:$0xff]  }
 0x317   : > { %v3575_v4 = vadd.f32 %v1921_v11, %v4843_v59  ;;  %v3589_v26 = vadd.f32 %v2063_v2, %v4847_v60  ;;  %v1923_v12 = vpop.f32.mrb[10].mxu0  ;;  %v2065_v5 = vpop.f32.mrb[42].mxu1  ;;  %2560 = vmatprep.mubr.bf16.mxu0 %v2111_v61  ;;  %v4121_v54 = vld [vmem:[#allocation8 + $0x184] ss:$8 sps:$4 sm:$0xff]   ;;  %v4124_v61 = vld [vmem:[#allocation8 + $0x194] ss:$8 sps:$4 sm:$0xff]  }
 0x318   : > { %v3576_v6 = vadd.f32 %v1923_v12, %v4836_v57  ;;  %v3590_v7 = vadd.f32 %v2065_v5, %v4840_v58  ;;  %v1925_v8 = vpop.f32.mrb[11].mxu0  ;;  %v2067_v9 = vpop.f32.mrb[43].mxu1  ;;  %2561 = vmatmul.mubr.bf16.gmra.mrb[20].mxu0 %v2110_v55  ;;  %v2094_v17 = vmax.f32 %v3574_v0, 0.0  ;;  %v2096_v18 = vmax.f32 %v3588_v1, 0.0  ;;  %v4119_v55 = vld [vmem:[#allocation8 + $0x180] ss:$8 sps:$4 sm:$0xff]  }
 0x319   : > { %v3577_v10 = vadd.f32 %v1925_v8, %v4843_v59  ;;  %v3591_v13 = vadd.f32 %v2067_v9, %v4847_v60  ;;  %2594 = vmatpush1.bf16.msra.mxu0 %v4101_v63  ;;  %v2095_v25 = vmax.f32 %v3575_v4, 0.0  ;;  %v2097_v32 = vmax.f32 %v3589_v26, 0.0  ;;  %v4127_v62 = vld [vmem:[#allocation8 + $0x1a4] ss:$8 sps:$4 sm:$0xff]   ;;  %v4125_v63 = vld [vmem:[#allocation8 + $0x1a0] ss:$8 sps:$4 sm:$0xff]  }
 0x31a   : > { %v2098_v20 = vmax.f32 %v3576_v6, 0.0  ;;  %v2100_v21 = vmax.f32 %v3590_v7, 0.0  ;;  %2595 = vmatprep.subr.bf16.mxu0 %v4106_v3  ;;  %v4130_v0 = vld [vmem:[#allocation8 + $0x1b4] ss:$8 sps:$4 sm:$0xff]   ;;  %v4128_v1 = vld [vmem:[#allocation8 + $0x1b0] ss:$8 sps:$4 sm:$0xff]  }
 0x31b   : > { %v2099_v33 = vmax.f32 %v3577_v10, 0.0  ;;  %v2101_v34 = vmax.f32 %v3591_v13, 0.0  ;;  %v4133_v11 = vld [vmem:[#allocation8 + $0x1c4] ss:$8 sps:$4 sm:$0xff]   ;;  %v4136_v2 = vld [vmem:[#allocation8 + $0x1d4] ss:$8 sps:$4 sm:$0xff]  }
 0x31c   : > { %v2114_v35 = vpack.c.bf16 %v2098_v20, %v2094_v17  ;;  %v4881_v36 = vpack.c.bf16 %v2100_v21, %v2096_v18  ;;  %v4134_v3 = vld [vmem:[#allocation8 + $0x1d0] ss:$8 sps:$4 sm:$0xff]   ;;  %v4139_v4 = vld [vmem:[#allocation8 + $0x1e4] ss:$8 sps:$4 sm:$0xff]   ;;  %v4137_v26 = vld [vmem:[#allocation8 + $0x1e0] ss:$8 sps:$4 sm:$0xff]  }
 0x31d   : > { %v2115_v28 = vpack.c.bf16 %v2099_v33, %v2095_v25  ;;  %v4883_v37 = vpack.c.bf16 %v2101_v34, %v2097_v32  ;;  %2596 = vmatpush1.bf16.msra.mxu0 %v4104_v14  ;;  %v1929_v38 = vpop.f32.mrb[12].mxu0  ;;  %v4885_v16 = vpop.f32.mrb[44].mxu1  ;;  %v4142_v12 = vld [vmem:[#allocation8 + $0x1f4] ss:$8 sps:$4 sm:$0xff]   ;;  %v4140_v5 = vld [vmem:[#allocation8 + $0x1f0] ss:$8 sps:$4 sm:$0xff]  }
 0x31e   : > { %v3578_v19 = vadd.f32 %v1929_v38, %v4836_v57  ;;  %v1931_v15 = vpop.f32.mrb[13].mxu0  ;;  %v4888_v40 = vpop.f32.mrb[45].mxu1  ;;  %2597 = vmatprep.subr.bf16.mxu0 %v4109_v23  ;;  %v4143_v6 = vld [vmem:[#allocation10 + $0x40] sm:$0xff]   ;;  %v4145_v8 = vld [vmem:[#allocation10 + $0x48] sm:$0xff]   ;;  %v4147_v10 = vld [vmem:[#allocation10 + $0x50] sm:$0xff]   ;;  %v3592_v21 = vadd.f32 %v4885_v16, %v4840_v58 }
 0x31f   : > { %v3579_v42 = vadd.f32 %v1931_v15, %v4843_v59  ;;  %v1933_v43 = vpop.f32.mrb[14].mxu0  ;;  %v2075_v44 = vpop.f32.mrb[46].mxu1  ;;  %2570 = vmatprep.mubr.bf16.mxu0 %v2115_v28  ;;  %v4116_v59 = vld [vmem:[#allocation8 + $0x170] ss:$8 sps:$4 sm:$0xff]   ;;  %v4144_v7 = vld [vmem:[#allocation10] sm:$0xff]   ;;  %v4146_v9 = vld [vmem:[#allocation10 + $0x8] sm:$0xff]   ;;  %v3593_v17 = vadd.f32 %v4888_v40, %v4847_v60 }
 0x320   : > { %v1934_v45 = vpop.f32.mrb[15].mxu0  ;;  %v2076_v46 = vpop.f32.mrb[47].mxu1  ;;  %2571 = vmatmul.mubr.bf16.gmra.mrb[24].mxu0 %v2114_v35  ;;  %v2102_v31 = vmax.f32 %v3578_v19, 0.0  ;;  %v4148_v13 = vld [vmem:[#allocation10 + $0x10] sm:$0xff]   ;;  %v4149_v14 = vld [vmem:[#allocation10 + $0x58] sm:$0xff]   ;;  %v4152_v20 = vld [vmem:[#allocation10 + $0x20] sm:$0xff]  }
 0x321   : > { %v2103_v30 = vmax.f32 %v3579_v42, 0.0  ;;  %2598 = vmatpush1.bf16.msra.mxu0 %v4107_v39  ;;  %v4150_v18 = vld [vmem:[#allocation10 + $0x18] sm:$0xff]   ;;  %v4153_v23 = vld [vmem:[#allocation10 + $0x68] sm:$0xff]   ;;  %v4155_v33 = vld [vmem:[#allocation10 + $0x70] sm:$0xff]  }
 0x322   : > { %2599 = vmatprep.subr.bf16.mxu0 %v4112_v41  ;;  %v2118_v51 = vpack.c.bf16 %v2102_v31, %v2102_v31  ;;  %v4154_v60 = vld [vmem:[#allocation10 + $0x28] sm:$0xff]   ;;  %v4156_v34 = vld [vmem:[#allocation10 + $0x30] sm:$0xff]   ;;  %v4157_v35 = vld [vmem:[#allocation10 + $0x78] sm:$0xff]  }
 0x323   : > { %v2119_v57 = vpack.c.bf16 %v2103_v30, %v2103_v30  ;;  %v4158_v28 = vld [vmem:[#allocation10 + $0x38] sm:$0xff]   ;;  %v4159_v58 = vld [vmem:[#allocation11] sm:$0xff]   ;;  %v2186_v38 = vld [vmem:[%s4991_s6 + $0x8] sm:$0x3] }
 0x324   : > { %3542 = vmatprep.subr.bf16.mxu1 %v4159_v58  ;;  %v2191_v16 = vrot.slane %v2186_v38, %v4774_v27  ;;  %v2195_v39 = vrot.slane %v2186_v38, %v4782_v29 }
 0x325   : > { %2600 = vmatpush1.bf16.msra.mxu0 %v4110_v47  ;;  %2580 = vmatprep.mubr.bf16.mxu0 %v2119_v57 }
 0x326   : > { %2601 = vmatprep.subr.bf16.mxu0 %v4115_v48  ;;  %3543 = vmatpush3.bf16.msra.mxu1 %v4159_v58  ;;  %v3452_v58 = vld [vmem:[%s4991_s6 + $0xa] ss:$0 sm:$0xff] }
 0x328   : > { %2581 = vmatmul.mubr.bf16.gmra.mrb[28].mxu0 %v2118_v51 }
 0x329   : > { %2602 = vmatpush1.bf16.msra.mxu0 %v4113_v50  ;;  %2621 = vmatprep.mubr.bf16.mxu0 %v4859_v24  ;;  %v4131_v24 = vld [vmem:[#allocation8 + $0x1c0] ss:$8 sps:$4 sm:$0xff]  }
 0x32a   : > { %2603 = vmatprep.subr.bf16.mxu0 %v4118_v53 }
 0x32d   : > { %2604 = vmatpush1.bf16.msra.mxu0 %v4116_v59 }
 0x32e   : > { %2605 = vmatprep.subr.bf16.mxu0 %v4121_v54 }
 0x331   : > { %2606 = vmatpush1.bf16.msra.mxu0 %v4119_v55 }
 0x332   : > { %2607 = vmatprep.subr.bf16.mxu0 %v4124_v61 }
 0x335   : > { %2608 = vmatpush1.bf16.msra.mxu0 %v4122_v52 }
 0x336   : > { %2609 = vmatprep.subr.bf16.mxu0 %v4127_v62 }
 0x339   : > { %2610 = vmatpush1.bf16.msra.mxu0 %v4125_v63 }
 0x33a   : > { %2611 = vmatprep.subr.bf16.mxu0 %v4130_v0 }
 0x33d   : > { %2612 = vmatpush1.bf16.msra.mxu0 %v4128_v1 }
 0x33e   : > { %2613 = vmatprep.subr.bf16.mxu0 %v4133_v11 }
 0x341   : > { %2614 = vmatpush1.bf16.msra.mxu0 %v4131_v24 }
 0x342   : > { %2615 = vmatprep.subr.bf16.mxu0 %v4136_v2 }
 0x345   : > { %2616 = vmatpush1.bf16.msra.mxu0 %v4134_v3 }
 0x346   : > { %2617 = vmatprep.subr.bf16.mxu0 %v4139_v4 }
 0x349   : > { %2618 = vmatpush1.bf16.msra.mxu0 %v4137_v26 }
 0x34a   : > { %2619 = vmatprep.subr.bf16.mxu0 %v4142_v12 }
 0x34d   : > { %2620 = vmatpush1.bf16.msra.mxu0 %v4140_v5 }
 0x34e   : > { %3490 = vmatprep.subr.bf16.mxu0 %v4143_v6 }
 0x350   : > { %2622 = vmatmul.mubr.bf16.vlgmr.msra.gmra.mrb[16].mxu0 %v4857_v22  ;;  %v4151_v22 = vld [vmem:[#allocation10 + $0x60] sm:$0xff]  }
 0x351   : > { %2631 = vmatprep.mubr.bf16.mxu0 %v4871_v49  ;;  %3491 = vmatpush3.bf16.msra.mxu0 %v4144_v7  ;;  %v2105_v49 = vmax.f32 %v3593_v17, 0.0 }
 0x352   : > { %3492 = vmatprep.subr.bf16.mxu0 %v4145_v8 }
 0x353   : > { %v2121_v25 = vpack.c.bf16 %v2105_v49, %v2105_v49 }
 0x355   : > { %3493 = vmatpush3.bf16.msra.mxu0 %v4146_v9 }
 0x356   : > { %3494 = vmatprep.subr.bf16.mxu0 %v4147_v10 }
 0x358   : > { %2632 = vmatmul.mubr.bf16.gmra.mrb[20].mxu0 %v4869_v56  ;;  %v2104_v56 = vmax.f32 %v3592_v21, 0.0 }
 0x359   : > { %2641 = vmatprep.mubr.bf16.mxu0 %v4883_v37  ;;  %3495 = vmatpush3.bf16.msra.mxu0 %v4148_v13  ;;  %v4160_v37 = vld [vmem:[#allocation11 + $0x8] sm:$0xff]  }
 0x35a   : > { %3496 = vmatprep.subr.bf16.mxu0 %v4149_v14  ;;  %v2120_v32 = vpack.c.bf16 %v2104_v56, %v2104_v56  ;;  %3544 = vmatprep.subr.bf16.mxu1 %v4160_v37  ;;  %v4162_v56 = vld [vmem:[#allocation11 + $0x18] sm:$0xff]  }
 0x35b   : > { %3545 = vmatpush3.bf16.msra.mxu1 %v4160_v37 }
 0x35d   : > { %3497 = vmatpush3.bf16.msra.mxu0 %v4150_v18 }
 0x35e   : > { %3498 = vmatprep.subr.bf16.mxu0 %v4151_v22 }
 0x360   : > { %2642 = vmatmul.mubr.bf16.gmra.mrb[24].mxu0 %v4881_v36  ;;  %v4161_v36 = vld [vmem:[#allocation11 + $0x10] sm:$0xff]  }
 0x361   : > { %2651 = vmatprep.mubr.bf16.mxu0 %v2121_v25  ;;  %3499 = vmatpush3.bf16.msra.mxu0 %v4152_v20 }
 0x362   : > { %3500 = vmatprep.subr.bf16.mxu0 %v4153_v23  ;;  %3546 = vmatprep.subr.bf16.mxu1 %v4161_v36 }
 0x363   : > { %3547 = vmatpush3.bf16.msra.mxu1 %v4161_v36 }
 0x364   : > { %3548 = vmatprep.subr.bf16.mxu1 %v4162_v56 }
 0x365   : > { %3501 = vmatpush3.bf16.msra.mxu0 %v4154_v60 }
 0x366   : > { %3502 = vmatprep.subr.bf16.mxu0 %v4155_v33  ;;  %v4164_v33 = vld [vmem:[#allocation11 + $0x28] sm:$0xff]  }
 0x367   : > { %3549 = vmatpush3.bf16.msra.mxu1 %v4162_v56 }
 0x368   : > { %2652 = vmatmul.mubr.bf16.gmra.mrb[28].mxu0 %v2120_v32  ;;  %v4163_v32 = vld [vmem:[#allocation11 + $0x20] sm:$0xff]  }
 0x369   : > { %3503 = vmatpush3.bf16.msra.mxu0 %v4156_v34  ;;  %3550 = vmatprep.subr.bf16.mxu1 %v4163_v32  ;;  %v4165_v34 = vld [vmem:[#allocation11 + $0x30] sm:$0xff]  }
 0x36a   : > { %3504 = vmatprep.subr.bf16.mxu0 %v4157_v35  ;;  %v4166_v35 = vld [vmem:[#allocation11 + $0x38] sm:$0xff]  }
 0x36b   : > { %3551 = vmatpush3.bf16.msra.mxu1 %v4163_v32 }
 0x36c   : > { %3552 = vmatprep.subr.bf16.mxu1 %v4164_v33 }
 0x36d   : > { %3505 = vmatpush3.bf16.msra.mxu0 %v4158_v28 }
 0x36f   : > { %3553 = vmatpush3.bf16.msra.mxu1 %v4164_v33 }
 0x370   : > { %3554 = vmatprep.subr.bf16.mxu1 %v4165_v34 }
 0x373   : > { %3555 = vmatpush3.bf16.msra.mxu1 %v4165_v34 }
 0x374   : > { %3556 = vmatprep.subr.bf16.mxu1 %v4166_v35 }
 0x377   : > { %3557 = vmatpush3.bf16.msra.mxu1 %v4166_v35 }
 0x423   : > { %v2623_v19 = vpop.f32.mrb[16].mxu0 }
 0x424   : > { %v3594_v15 = vadd.f32 %v2623_v19, %v2191_v16  ;;  %v2625_v40 = vpop.f32.mrb[17].mxu0 }
 0x425   : > { %v3595_v41 = vadd.f32 %v2625_v40, %v2195_v39  ;;  %v2627_v42 = vpop.f32.mrb[18].mxu0 }
 0x426   : > { %v3596_v43 = vadd.f32 %v2627_v42, %v2191_v16  ;;  %v2629_v44 = vpop.f32.mrb[19].mxu0  ;;  %v2660_v46 = vmax.f32 %v3594_v15, 0.0 }
 0x427   : > { %v3597_v45 = vadd.f32 %v2629_v44, %v2195_v39  ;;  %v2661_v47 = vmax.f32 %v3595_v41, 0.0 }
 0x428   : > { %v2662_v30 = vmax.f32 %v3596_v43, 0.0 }
 0x429   : > { %v2663_v31 = vmax.f32 %v3597_v45, 0.0 }
 0x42a   : > { %v2674_v48 = vpack.c.bf16 %v2662_v30, %v2660_v46 }
 0x42b   : > { %v2675_v57 = vpack.c.bf16 %v2663_v31, %v2661_v47  ;;  %v2633_v50 = vpop.f32.mrb[20].mxu0 }
 0x42c   : > { %v3598_v51 = vadd.f32 %v2633_v50, %v2191_v16  ;;  %v2635_v53 = vpop.f32.mrb[21].mxu0 }
 0x42d   : > { %v3599_v27 = vadd.f32 %v2635_v53, %v2195_v39  ;;  %v2637_v59 = vpop.f32.mrb[22].mxu0  ;;  %2849 = vmatprep.mubr.bf16.mxu0 %v2675_v57 }
 0x42e   : > { %v3600_v29 = vadd.f32 %v2637_v59, %v2191_v16  ;;  %v2639_v54 = vpop.f32.mrb[23].mxu0  ;;  %2850 = vmatmul.mubr.bf16.vlgmr.msra.gmra.mrb[32].mxu0 %v2674_v48  ;;  %v2664_v61 = vmax.f32 %v3598_v51, 0.0 }
 0x42f   : > { %v3601_v55 = vadd.f32 %v2639_v54, %v2195_v39  ;;  %v2665_v62 = vmax.f32 %v3599_v27, 0.0 }
 0x430   : > { %v2666_v52 = vmax.f32 %v3600_v29, 0.0 }
 0x431   : > { %v2667_v63 = vmax.f32 %v3601_v55, 0.0 }
 0x432   : > { %v2676_v0 = vpack.c.bf16 %v2666_v52, %v2664_v61 }
 0x433   : > { %v2677_v1 = vpack.c.bf16 %v2667_v63, %v2665_v62  ;;  %v2643_v11 = vpop.f32.mrb[24].mxu0 }
 0x434   : > { %v3602_v24 = vadd.f32 %v2643_v11, %v2191_v16  ;;  %v2645_v2 = vpop.f32.mrb[25].mxu0 }
 0x435   : > { %v3603_v3 = vadd.f32 %v2645_v2, %v2195_v39  ;;  %v2647_v4 = vpop.f32.mrb[26].mxu0  ;;  %2857 = vmatprep.mubr.bf16.mxu0 %v2677_v1 }
 0x436   : > { %v3604_v26 = vadd.f32 %v2647_v4, %v2191_v16  ;;  %v2649_v12 = vpop.f32.mrb[27].mxu0  ;;  %2858 = vmatmul.mubr.bf16.gmra.mrb[36].mxu0 %v2676_v0  ;;  %v2668_v6 = vmax.f32 %v3602_v24, 0.0 }
 0x437   : > { %v3605_v5 = vadd.f32 %v2649_v12, %v2195_v39  ;;  %v2669_v8 = vmax.f32 %v3603_v3, 0.0 }
 0x438   : > { %v2670_v7 = vmax.f32 %v3604_v26, 0.0 }
 0x439   : > { %v2671_v9 = vmax.f32 %v3605_v5, 0.0  ;;  %v3469_v5 = vld [vmem:[%s4991_s6 + $0xb] ss:$0 sm:$0xff] }
 0x43a   : > { %v2678_v10 = vpack.c.bf16 %v2670_v7, %v2668_v6 }
 0x43b   : > { %v2679_v13 = vpack.c.bf16 %v2671_v9, %v2669_v8  ;;  %v2653_v14 = vpop.f32.mrb[28].mxu0 }
 0x43c   : > { %v3606_v17 = vadd.f32 %v2653_v14, %v2191_v16  ;;  %v2655_v18 = vpop.f32.mrb[29].mxu0 }
 0x43d   : > { %v3607_v22 = vadd.f32 %v2655_v18, %v2195_v39  ;;  %v2657_v49 = vpop.f32.mrb[30].mxu0  ;;  %2865 = vmatprep.mubr.bf16.mxu0 %v2679_v13 }
 0x43e   : > { %v2658_v20 = vpop.f32.mrb[31].mxu0  ;;  %2866 = vmatmul.mubr.bf16.gmra.mrb[40].mxu0 %v2678_v10  ;;  %v2672_v23 = vmax.f32 %v3606_v17, 0.0 }
 0x43f   : > { %v2673_v21 = vmax.f32 %v3607_v22, 0.0 }
 0x440   : > { %v2680_v60 = vpack.c.bf16 %v2672_v23, %v2672_v23 }
 0x441   : > { %v2681_v25 = vpack.c.bf16 %v2673_v21, %v2673_v21 }
 0x443   : > { %2873 = vmatprep.mubr.bf16.mxu0 %v2681_v25 }
 0x446   : > { %2874 = vmatmul.mubr.bf16.gmra.mrb[44].mxu0 %v2680_v60 }
 0x501   : > { %v3506_v28 = vpop.f32.mrb[32].mxu0 }
 0x502   : > { %v3507_v37 = vpop.f32.mrb[33].mxu0 }
 0x503   : > { %v3508_v36 = vadd.f32 %v3507_v37, %v3506_v28  ;;  %v3509_v38 = vpop.f32.mrb[34].mxu0 }
 0x504   : > { %v3510_v16 = vpop.f32.mrb[35].mxu0 }
 0x505   : > { %v2852_v39 = vadd.f32 %v3508_v36, %v3452_v58  ;;  %v3511_v19 = vadd.f32 %v3510_v16, %v3509_v38 }
 0x507   : > { %v2855_v15 = vadd.f32 %v3511_v19, %v3452_v58  ;;  %v2881_v40 = vmax.f32 %v2852_v39, 0.0 }
 0x509   : > { %v2882_v41 = vmax.f32 %v2855_v15, 0.0  ;;  %v3512_v42 = vpop.f32.mrb[36].mxu0 }
 0x50a   : > { %v3513_v43 = vpop.f32.mrb[37].mxu0 }
 0x50b   : > { %v3514_v44 = vadd.f32 %v3513_v43, %v3512_v42  ;;  %v3515_v45 = vpop.f32.mrb[38].mxu0  ;;  %v2888_v46 = vpack.c.bf16 %v2882_v41, %v2881_v40 }
 0x50c   : > { %v3516_v30 = vpop.f32.mrb[39].mxu0 }
 0x50d   : > { %v2860_v47 = vadd.f32 %v3514_v44, %v3452_v58  ;;  %v3517_v31 = vadd.f32 %v3516_v30, %v3515_v45  ;;  %3558 = vmatprep.mubr.bf16.mxu1 %v2888_v46 }
 0x50f   : > { %v2863_v48 = vadd.f32 %v3517_v31, %v3452_v58  ;;  %v2883_v57 = vmax.f32 %v2860_v47, 0.0 }
 0x511   : > { %v2884_v50 = vmax.f32 %v2863_v48, 0.0  ;;  %v3518_v51 = vpop.f32.mrb[40].mxu0 }
 0x512   : > { %v3519_v53 = vpop.f32.mrb[41].mxu0 }
 0x513   : > { %v2889_v27 = vpack.c.bf16 %v2884_v50, %v2883_v57  ;;  %v3520_v59 = vadd.f32 %v3519_v53, %v3518_v51  ;;  %v3521_v29 = vpop.f32.mrb[42].mxu0 }
 0x514   : > { %v3522_v54 = vpop.f32.mrb[43].mxu0 }
 0x515   : > { %v2868_v55 = vadd.f32 %v3520_v59, %v3452_v58  ;;  %v3523_v61 = vadd.f32 %v3522_v54, %v3521_v29  ;;  %3559 = vmatmul.mubr.bf16.vlgmr.msra.gmra.mrb[48].mxu1 %v2889_v27 }
 0x517   : > { %v2871_v52 = vadd.f32 %v3523_v61, %v3452_v58  ;;  %v2885_v62 = vmax.f32 %v2868_v55, 0.0 }
 0x519   : > { %v2886_v63 = vmax.f32 %v2871_v52, 0.0  ;;  %v3524_v0 = vpop.f32.mrb[44].mxu0 }
 0x51a   : > { %v3525_v1 = vpop.f32.mrb[45].mxu0 }
 0x51b   : > { %v3526_v11 = vadd.f32 %v3525_v1, %v3524_v0  ;;  %v3527_v24 = vpop.f32.mrb[46].mxu0  ;;  %v2890_v2 = vpack.c.bf16 %v2886_v63, %v2885_v62 }
 0x51c   : > { %v3528_v3 = vpop.f32.mrb[47].mxu0 }
 0x51d   : > { %v2876_v4 = vadd.f32 %v3526_v11, %v3452_v58  ;;  %3562 = vmatprep.mubr.bf16.mxu1 %v2890_v2 }
 0x51f   : > { %v2887_v26 = vmax.f32 %v2876_v4, 0.0 }
 0x521   : > { %v2891_v12 = vpack.c.bf16 %v2887_v26, %v2887_v26 }
 0x523   : > { %3563 = vmatmul.mubr.bf16.gmra.mrb[52].mxu1 %v2891_v12 }
 0x5e8   : > { %v3560_v6 = vpop.f32.mrb[48].mxu1 }
 0x5e9   : > { %v3006_v7 = vadd.f32 %v3560_v6, %v3469_v5  ;;  %v2997_v8 = vpop.f32.mrb[49].mxu1 }
 0x5ea   : > { %v2998_v9 = vadd.f32 %v3469_v5, %v2997_v8  ;;  %v3561_v10 = vpop.f32.mrb[50].mxu1 }
 0x5eb   : > { %3029 = vst [vmem:[%s4913_s9 + $0x10] sm:$0xff] %v3006_v7  ;;  %v3009_v13 = vadd.f32 %v3561_v10, %v3469_v5  ;;  %v3000_v14 = vpop.f32.mrb[51].mxu1 }
 0x5ec   : > { %3027 = vst [vmem:[%s4913_s9] sm:$0xff] %v2998_v9  ;;  %v3001_v17 = vadd.f32 %v3469_v5, %v3000_v14 }
 0x5ed   : > { %3030 = vst [vmem:[%s4913_s9 + $0x18] sm:$0xff] %v3009_v13 }
 0x5ee   : > { %3028 = vst [vmem:[%s4913_s9 + $0x8] sm:$0xff] %v3001_v17 }
 0x5f6   : > { %v3564_v18 = vpop.f32.mrb[52].mxu1  ;;  %3041 = sbr.rel (!%p5031_p3) target bundleno = 1562 (0x61a), region = 76 }
 0x5f7   : > { %v3022_v22 = vadd.f32 %v3564_v18, %v3469_v5  ;;  %v3013_v49 = vpop.f32.mrb[53].mxu1 }
 0x5f8   : > { %v3014_v20 = vadd.f32 %v3469_v5, %v3013_v49  ;;  %v3565_v21 = vpop.f32.mrb[54].mxu1 }
 0x5f9   : > { %3033 = vst [vmem:[%s4913_s9 + $0x30] sm:$0xff] %v3022_v22  ;;  %v3016_v23 = vpop.f32.mrb[55].mxu1 }
 0x5fa   : > { %3031 = vst [vmem:[%s4913_s9 + $0x20] sm:$0xff] %v3014_v20  ;;  %v3017_v25 = vadd.f32 %v3469_v5, %v3016_v23 }
 0x5fc   : > { %3032 = vst [vmem:[%s4913_s9 + $0x28] sm:$0xff] %v3017_v25 }
 0x5fd   : > { %s5044_s8 = smov (!%p3044_p6, %s3043_s8), 7 }
 0x5fe   : > { %s4926_s7 = sshll.u32 %s5044_s8, 7 }
 0x5ff   : > { %s3048_s22 = ssub.s32 896, %s4926_s7 }
 0x600   : > { %3049 = vsyncadd %s3035_s20, %s3048_s22  ;;  %p3479_p11 = scmp.ne.s32.totalorder %s4926_s7, 0  ;;  %s3488_s30 = smul.u32 896, %s4493_s28 }
 0x601   : > { %s3054_s10 = sshll.u32 %s4913_s9, 4  ;;  %s5032_s18 = sld [smem:[#allocation25_spill]]  ;;  %s4939_s10 = int_to_ptr.vmem [resolvable:$true] %s3054_s10 }
 0x602   : > { %s4335_s13 = scalar_lea.vmem %s4939_s10, %s4926_s7  ;;  %s4429_s24 = smov [#allocation13]  }
 0x603   : > { %p4336_p13 = scmp.ne.s32.totalorder %s4939_s10, %s4335_s13  ;;  %s4339_s14 = sshll.u32 %s4429_s24, 4  ;;  %s4340_s14 = int_to_ptr.vmem [resolvable:$false] %s4339_s14 }
 0x604   : > { %s4341_s28 = scalar_lea.vmem %s4340_s14, 1792  ;;  %p4342_p7 = scmp.lt.s32.totalorder %s4939_s10, %s4340_s14 }
 0x605   : > { %p4337_p0 = pnand %p4336_p13, %p3479_p11  ;;  %p4343_p2 = scmp.lt.s32.totalorder %s4341_s28, %s4335_s13 }
 0x607   : > { %s4937_s17 = scalar_lea.hbm %s5032_s18, %s3488_s30  ;;  %p4338_p12 = pneg %p4337_p0 }
 0x608   : > { %p4344_p8 = por %p4343_p2, %p4342_p7 }
 0x60a   : > { %p4345_p9 = pnand %p4344_p8, %p4338_p12 }
 0x60c   : > { %4348 = shalt.err (!%p4345_p9)
}
 0x60d   : > { %s4349_s23 = scalar_lea.hbm %s4937_s17, %s4926_s7  ;;  %s4353_s21 = scalar_lea.hbm %s5032_s18, 1664 }
 0x60e   : > { %p4350_p10 = scmp.ne.s32.totalorder %s4937_s17, %s4349_s23  ;;  %p4354_p3 = scmp.lt.u32.totalorder %s4937_s17, %s5032_s18 }
 0x60f   : > { %p4355_p6 = scmp.lt.u32.totalorder %s4353_s21, %s4349_s23  ;;  %p4357_p0 = scmp.lt.u32.totalorder %s4349_s23, %s4937_s17 }
 0x610   : > { %p4351_p1 = pnand %p4350_p10, %p3479_p11 }
 0x611   : > { %p4356_p13 = por %p4355_p6, %p4354_p3 }
 0x612   : > { %p4352_p5 = pneg %p4351_p1 }
 0x613   : > { %p4358_p12 = por %p4357_p0, %p4356_p13 }
 0x615   : > { %p4359_p7 = pnand %p4358_p12, %p4352_p5 }
 0x617   : > { %4362 = shalt.err (!%p4359_p7)
}
 0x618   : > { %s4430_s29 = smov 128   ;;  %s4431_s8 = smov 8  }
 0x619   : > { %3060 = dma.vmem_to_hbm [thread:$0]  (%p3479_p11), %s4939_s10, %s4926_s7, %s4937_s17, %s3035_s20, %s4430_s29, %s4430_s29, %s4431_s8  }
 0x61a PF: > { %s5033_s22 = sld [smem:[#allocation19_spill]]  ;;  %s5034_s30 = sld [smem:[#allocation23_spill]] }
 0x620   : > { %s3069_s12 = sand.u32 1, %s5033_s22   ;;  %p5035_p2 = scmp.ne.s32.totalorder %s5034_s30, 0 }
 0x621   : > { %s3070_s15 = scalar_lea.sflag [#allocation4], %s3069_s12 }
 0x622   : > { %p3698_p8 = pnand %p3182_p4, %p5035_p2 }
 0x624   : > { %4396 = dma.done.wait (!%p3698_p8), %s3070_s15, 896  }
 0x625   : > { %4398 = vsyncadd (!%p3698_p8), %s3070_s15, 4294966400  ;;  %s5036_s27 = sld [smem:[#allocation20_spill]]  ;;  %s5037_s13 = sld [smem:[#allocation21_spill]] }
 0x626   : > { %s5038_s24 = smov %s4405_s25  ;;  %s5039_s25 = smov %s4409_s26 }
 0x62b   : > { %p23_p9 = scmp.ge.s32.totalorder %s5036_s27, 4   ;;  %s5040_s26 = smov %s5037_s13 }
 0x62d   :  { %25 = sbr.rel (!%p23_p9) target bundleno = 11 (0xb), region = 113 }
 0x634   :  { %3075 = vsyncpa [#allocation3], 1 }
 0x635   :  { %3077 = vsyncpa [#allocation3 + $0x1], 1 }
 0x636   :  { %3078 = vsyncpa [#allocation6], 1 }
 0x637   :  { %3079 = vsyncpa [#allocation9], 1 }
 0x638   :  { %3080 = vsyncpa [#allocation12], 1 }
 0x639   :  { %3081 = vsyncpa [#allocation4], 1 }
 0x63a   :  { %3083 = vsyncpa [#allocation4 + $0x1], 1 }

</bundles_post_ra>
